<compile_context>
chip_gen: v6e
topology: v6e:2x2x1
jax: 0.10.0
libtpu: 0.0.40
codegen_flags: <defaults>
</compile_context>

<pallas_src>
import functools

import jax
import jax.numpy as jnp
from jax.experimental import pallas as pl
from jax.experimental.pallas import tpu as pltpu


HP = 128              # padded (lane-dense) feature width used inside the kernel
NUM_GNN_LAYERS = 5


# ----------------------------------------------------------------------------
# Fused kernel: edgeToNode -> 5x NodeGNN -> regressor
# ----------------------------------------------------------------------------
def _energy_gnn_kernel(src_ref, dst_ref, ea_ref,
                       e2n_w1_ref, e2n_b1_ref, e2n_w2_ref, e2n_b2_ref,
                       g_w1_ref, g_b1_ref, g_w2_ref, g_b2_ref,
                       g_wself_ref, g_bself_ref,
                       reg_w1_ref, reg_b1_ref, reg_w2_ref, reg_b2_ref,
                       out_ref, *, num_layers):
    f32, bf16 = jnp.float32, jnp.bfloat16

    ea16 = ea_ref[...]                       # (E, HP) bf16, zero-padded features
    E = ea16.shape[0]
    N = out_ref.shape[0]

    def dot(a, b):
        return jnp.dot(a, b, preferred_element_type=f32)

    # ---- one-hot scatter (dst) / gather (src) matrices, built ONCE in bf16 ----
    S16 = (jax.lax.broadcasted_iota(jnp.int32, (N, E), 0)
           == dst_ref[...]).astype(bf16)                     # (N, E)
    G16 = (jax.lax.broadcasted_iota(jnp.int32, (E, N), 1)
           == src_ref[...]).astype(bf16)                     # (E, N)
    # exact in-degree via an MXU row-sum (f32 accumulation), exact reciprocal
    cnt = dot(S16, jnp.ones((E, 1), bf16))                   # (N, 1) f32
    inv_deg = 1.0 / jnp.maximum(cnt, 1.0)                    # (N, 1) f32

    # ---- edgeToNode: x = scatter_mean(MLP(edge_attr), dst) ----
    h = jnp.maximum(dot(ea16, e2n_w1_ref[...]) + e2n_b1_ref[...], 0.0)
    msg = dot(h.astype(bf16), e2n_w2_ref[...]) + e2n_b2_ref[...]
    x = dot(S16, msg.astype(bf16)) * inv_deg                 # (N, HP) f32

    # ---- 5x NodeGNN: out = lin_self(x) + scatter_mean(MLP([x_src, ea]), dst) ----
    for i in range(num_layers):
        x16 = x.astype(bf16)
        x_j = dot(G16, x16)                                  # gather x[src] -> (E, HP) f32
        # K=256 fused first matmul: [x_j | ea] @ [w1x ; w1e]
        cat = jnp.concatenate([x_j.astype(bf16), ea16], axis=1)   # (E, 2*HP) bf16
        h = jnp.maximum(dot(cat, g_w1_ref[i]) + g_b1_ref[i], 0.0)
        msg = dot(h.astype(bf16), g_w2_ref[i]) + g_b2_ref[i]      # (E, HP) f32
        aggr = dot(S16, msg.astype(bf16)) * inv_deg               # scatter-mean (N, HP)
        x = dot(x16, g_wself_ref[i]) + g_bself_ref[i] + aggr
        if i < num_layers - 1:
            x = jnp.maximum(x, 0.0)

    # ---- regressor; only column 0 of reg_w2/reg_b2 is real -> write (N, 1) ----
    h = jnp.maximum(dot(x.astype(bf16), reg_w1_ref[...]) + reg_b1_ref[...], 0.0)
    y = dot(h.astype(bf16), reg_w2_ref[...]) + reg_b2_ref[...]    # (N, HP) f32
    out_ref[...] = y[:, :1]


# ----------------------------------------------------------------------------
# Host-side packing / wrapper
# ----------------------------------------------------------------------------
_VMEM = pl.BlockSpec(memory_space=pltpu.MemorySpace.VMEM)


def pack_params(params, hidden, edge_feat, hp=HP):
    """Pad weights to lane-aligned shapes and pre-cast to bf16 (MXU operands);
    biases stay f32 (added to f32 accumulators). The 5 NodeGNN layers are
    stacked along a leading axis; w1x/w1e are fused into one (2*hp, hp) weight
    so the per-layer first matmul runs at K=256. Zero padding is exact, so
    padded lanes stay zero through the whole network."""
    assert hidden <= hp and edge_feat <= hp

    def pad_w(w):
        r, c = w.shape
        return jnp.pad(w, ((0, hp - r), (0, hp - c))).astype(jnp.bfloat16)

    def pad_w_f32(w):
        r, c = w.shape
        return jnp.pad(w, ((0, hp - r), (0, hp - c)))

    def pad_b(b):
        return jnp.pad(b, ((0, 0), (0, hp - b.shape[1]))).astype(jnp.float32)

    packed = {
        "e2n_w1": pad_w(params["e2n"]["w1"]), "e2n_b1": pad_b(params["e2n"]["b1"]),
        "e2n_w2": pad_w(params["e2n"]["w2"]), "e2n_b2": pad_b(params["e2n"]["b2"]),
        "reg_w1": pad_w(params["reg"]["w1"]), "reg_b1": pad_b(params["reg"]["b1"]),
        "reg_w2": pad_w(params["reg"]["w2"]), "reg_b2": pad_b(params["reg"]["b2"]),
    }
    # K=256 fusion: stack [w1x ; w1e] -> (2*hp, hp) per layer.
    gw1 = []
    for i in range(1, NUM_GNN_LAYERS + 1):
        p = params[f"gnn{i}"]
        gw1.append(jnp.concatenate(
            [pad_w_f32(p["w1x"]), pad_w_f32(p["w1e"])], axis=0).astype(jnp.bfloat16))
    packed["gnn_w1"] = jnp.stack(gw1)                               # (5, 2*hp, hp)
    for name in ("w2", "wself"):
        packed[f"gnn_{name}"] = jnp.stack(
            [pad_w(params[f"gnn{i}"][name]) for i in range(1, NUM_GNN_LAYERS + 1)])
    for name in ("b1", "b2", "bself"):
        packed[f"gnn_{name}"] = jnp.stack(
            [pad_b(params[f"gnn{i}"][name]) for i in range(1, NUM_GNN_LAYERS + 1)])
    return packed


def _vmem_limit_bytes(num_nodes, num_edges, hp=HP, num_layers=NUM_GNN_LAYERS):
    """Conservative resident-VMEM estimate (bytes) for the fused kernel."""
    n = max(-(-num_nodes // 8) * 8, 8)
    e = max(-(-num_edges // 8) * 8, 8)
    n_l = max(n, 128)                    # lane-padded extents for the one-hots
    e_l = max(e, 128)
    onehots = n * e_l * 2 + e * n_l * 2                  # S16 + G16 (bf16)
    edge_live = e * hp * (2 + 2 * 2 + 3 * 4)             # ea16, [x_j|ea], x_j/h/msg f32
    node_live = n * hp * 4 * 4                           # x / aggr / h / y f32
    weights = (4 + 4 * num_layers + 4) * hp * hp * 2 + (4 + 3 * num_layers) * hp * 4
    total = onehots + edge_live + node_live + weights
    return int(min(max(2 * total, 16 * 2**20), 100 * 2**20))


@functools.partial(jax.jit, static_argnames=("num_nodes",))
def _forward_jit(edge_index, edge_attr, packed, *, num_nodes):
    E, F = edge_attr.shape
    src = edge_index[0].astype(jnp.int32).reshape(E, 1)   # (E, 1) broadcast column
    dst = edge_index[1].astype(jnp.int32).reshape(1, E)   # (1, E) lane-dense row
    # edge features: pad to 128 lanes and pre-cast to bf16 (only ever an MXU operand)
    ea = jnp.pad(edge_attr, ((0, 0), (0, HP - F))).astype(jnp.bfloat16)

    out = pl.pallas_call(
        functools.partial(_energy_gnn_kernel, num_layers=NUM_GNN_LAYERS),
        out_shape=jax.ShapeDtypeStruct((num_nodes, 1), jnp.float32),
        in_specs=[_VMEM] * 17,
        out_specs=_VMEM,
        compiler_params=pltpu.CompilerParams(
            vmem_limit_bytes=_vmem_limit_bytes(num_nodes, E)),
    )(src, dst, ea,
      packed["e2n_w1"], packed["e2n_b1"], packed["e2n_w2"], packed["e2n_b2"],
      packed["gnn_w1"], packed["gnn_b1"], packed["gnn_w2"], packed["gnn_b2"],
      packed["gnn_wself"], packed["gnn_bself"],
      packed["reg_w1"], packed["reg_b1"], packed["reg_w2"], packed["reg_b2"])
    return out                                            # (N, 1) regression values


def energy_gnn_forward(edge_index, edge_attr, packed, num_nodes=None):
    if num_nodes is None:
        # Matches torch's edge_index.max().item() + 1, but forces a host sync.
        # Pass num_nodes explicitly to keep the forward fully async/jit-able.
        num_nodes = int(jax.device_get(jnp.max(edge_index))) + 1
    return _forward_jit(edge_index, edge_attr, packed, num_nodes=num_nodes)


# ----------------------------------------------------------------------------
# Deterministic parameter init + pure-JAX f32 reference
# ----------------------------------------------------------------------------
def init_params(key, edge_feat, latent, hidden):
    keys = iter(jax.random.split(key, 64))

    def w(shape):
        return jax.random.normal(next(keys), shape, jnp.float32) * 0.1

    def b(n):
        return jax.random.normal(next(keys), (1, n), jnp.float32) * 0.01

    params = {
        "e2n": {"w1": w((edge_feat, latent)), "b1": b(latent),
                "w2": w((latent, latent)), "b2": b(latent)},
        "reg": {"w1": w((hidden, hidden)), "b1": b(hidden),
                "w2": w((hidden, 1)), "b2": b(1)},
    }
    for i in range(1, NUM_GNN_LAYERS + 1):
        params[f"gnn{i}"] = {
            "w1x": w((hidden, hidden)), "w1e": w((edge_feat, hidden)), "b1": b(hidden),
            "w2": w((hidden, hidden)), "b2": b(hidden),
            "wself": w((hidden, hidden)), "bself": b(hidden),
        }
    return params


def _ref_forward(edge_index, edge_attr, params, num_nodes):
    src = edge_index[0]
    dst = edge_index[1]
    E = edge_attr.shape[0]

    def scatter_mean(msg):
        s = jax.ops.segment_sum(msg, dst, num_segments=num_nodes)
        c = jax.ops.segment_sum(jnp.ones((E,), jnp.float32), dst, num_segments=num_nodes)
        return s / jnp.maximum(c, 1.0)[:, None]

    p = params["e2n"]
    msg = jax.nn.relu(edge_attr @ p["w1"] + p["b1"]) @ p["w2"] + p["b2"]
    x = scatter_mean(msg)

    for i in range(1, NUM_GNN_LAYERS + 1):
        p = params[f"gnn{i}"]
        x_j = x[src]
        h = jax.nn.relu(x_j @ p["w1x"] + edge_attr @ p["w1e"] + p["b1"])
        msg = h @ p["w2"] + p["b2"]
        x = x @ p["wself"] + p["bself"] + scatter_mean(msg)
        if i < NUM_GNN_LAYERS:
            x = jax.nn.relu(x)

    p = params["reg"]
    return jax.nn.relu(x @ p["w1"] + p["b1"]) @ p["w2"] + p["b2"]


# ----------------------------------------------------------------------------
if __name__ == "__main__":
    EDGE_FEAT = 8
    HIDDEN = 32
    LATENT = HIDDEN          # forward semantics require latent_size == hidden_size
    NUM_NODES = 8
    NUM_EDGES = 16

    key = jax.random.PRNGKey(0)
    k_par, k_ea = jax.random.split(key)

    # deterministic graph: guarantee node index NUM_NODES-1 appears (num_nodes = max+1)
    src_idx = jnp.arange(NUM_EDGES, dtype=jnp.int32) % NUM_NODES
    dst_idx = (3 * jnp.arange(NUM_EDGES, dtype=jnp.int32) + 1) % NUM_NODES
    edge_index = jnp.stack([src_idx, dst_idx], axis=0)                  # (2, E)
    edge_attr = jax.random.normal(k_ea, (NUM_EDGES, EDGE_FEAT), jnp.float32)

    params = init_params(k_par, EDGE_FEAT, LATENT, HIDDEN)
    packed = pack_params(params, HIDDEN, EDGE_FEAT)

    out = energy_gnn_forward(edge_index, edge_attr, packed, num_nodes=NUM_NODES)
    out = jax.block_until_ready(out)

    ref = _ref_forward(edge_index, edge_attr, params, NUM_NODES)
    assert out.shape == (NUM_NODES, 1)
    # bf16 MXU operands vs a pure-f32 reference (scatter-mean is now exact).
    max_err = float(jnp.max(jnp.abs(out - ref)))
    assert jnp.allclose(out, ref, atol=2e-2, rtol=2e-2), (max_err, out, ref)

    print("KERNEL_OK")
</pallas_src>

<mosaic_0001>
module attributes {stable_mosaic.version = 11 : i64} {
  func.func @_energy_gnn_kernel(%arg0: memref<16x1xi32, #tpu.memory_space<vmem>>, %arg1: memref<1x16xi32, #tpu.memory_space<vmem>>, %arg2: memref<16x128xbf16, #tpu.memory_space<vmem>>, %arg3: memref<128x128xbf16, #tpu.memory_space<vmem>>, %arg4: memref<1x128xf32, #tpu.memory_space<vmem>>, %arg5: memref<128x128xbf16, #tpu.memory_space<vmem>>, %arg6: memref<1x128xf32, #tpu.memory_space<vmem>>, %arg7: memref<5x256x128xbf16, #tpu.memory_space<vmem>>, %arg8: memref<5x1x128xf32, #tpu.memory_space<vmem>>, %arg9: memref<5x128x128xbf16, #tpu.memory_space<vmem>>, %arg10: memref<5x1x128xf32, #tpu.memory_space<vmem>>, %arg11: memref<5x128x128xbf16, #tpu.memory_space<vmem>>, %arg12: memref<5x1x128xf32, #tpu.memory_space<vmem>>, %arg13: memref<128x128xbf16, #tpu.memory_space<vmem>>, %arg14: memref<1x128xf32, #tpu.memory_space<vmem>>, %arg15: memref<128x128xbf16, #tpu.memory_space<vmem>>, %arg16: memref<1x128xf32, #tpu.memory_space<vmem>>, %arg17: memref<8x1xf32, #tpu.memory_space<vmem>>) attributes {dimension_semantics = [], scalar_prefetch = 0 : i64, scratch_operands = 0 : i64, tpu.core_type = #tpu.core_type<tc>} {
    %c0 = arith.constant 0 : index
    %c0_0 = arith.constant 0 : index
    %0 = vector.load %arg2[%c0, %c0_0] : memref<16x128xbf16, #tpu.memory_space<vmem>>, vector<16x128xbf16>
    %1 = tpu.iota {dimensions = array<i32: 0>} : vector<8x16xi32>
    %c0_1 = arith.constant 0 : index
    %c0_2 = arith.constant 0 : index
    %2 = vector.load %arg1[%c0_1, %c0_2] : memref<1x16xi32, #tpu.memory_space<vmem>>, vector<1x16xi32>
    %3 = vector.broadcast %2 : vector<1x16xi32> to vector<8x16xi32>
    %4 = arith.cmpi eq, %1, %3 : vector<8x16xi32>
    %5 = arith.extui %4 : vector<8x16xi1> to vector<8x16xi32>
    %6 = arith.sitofp %5 : vector<8x16xi32> to vector<8x16xf32>
    %7 = arith.truncf %6 : vector<8x16xf32> to vector<8x16xbf16>
    %8 = tpu.iota {dimensions = array<i32: 1>} : vector<16x8xi32>
    %c0_3 = arith.constant 0 : index
    %c0_4 = arith.constant 0 : index
    %9 = vector.load %arg0[%c0_3, %c0_4] : memref<16x1xi32, #tpu.memory_space<vmem>>, vector<16x1xi32>
    %10 = vector.broadcast %9 : vector<16x1xi32> to vector<16x8xi32>
    %11 = arith.cmpi eq, %8, %10 : vector<16x8xi32>
    %12 = arith.extui %11 : vector<16x8xi1> to vector<16x8xi32>
    %13 = arith.sitofp %12 : vector<16x8xi32> to vector<16x8xf32>
    %14 = arith.truncf %13 : vector<16x8xf32> to vector<16x8xbf16>
    %cst = arith.constant 1.000000e+00 : bf16
    %15 = vector.broadcast %cst : bf16 to vector<16x1xbf16>
    %cst_5 = arith.constant dense<0.000000e+00> : vector<8x1xf32>
    %16 = tpu.matmul %7, %15, %cst_5 {dimension_numbers = #tpu.dot_dimension_numbers<[1], [0], [0], [1], [0, 0, 1, 1], [], []>} : vector<8x16xbf16>, vector<16x1xbf16>, vector<8x1xf32> -> vector<8x1xf32>
    %cst_6 = arith.constant 1.000000e+00 : f32
    %17 = vector.broadcast %cst_6 : f32 to vector<8x1xf32>
    %18 = arith.maximumf %16, %17 : vector<8x1xf32>
    %cst_7 = arith.constant 1.000000e+00 : f32
    %19 = vector.broadcast %cst_7 : f32 to vector<8x1xf32>
    %20 = arith.divf %19, %18 : vector<8x1xf32>
    %c0_8 = arith.constant 0 : index
    %c0_9 = arith.constant 0 : index
    %21 = vector.load %arg3[%c0_8, %c0_9] : memref<128x128xbf16, #tpu.memory_space<vmem>>, vector<128x128xbf16>
    %cst_10 = arith.constant dense<0.000000e+00> : vector<16x128xf32>
    %22 = tpu.matmul %0, %21, %cst_10 {dimension_numbers = #tpu.dot_dimension_numbers<[1], [0], [0], [1], [0, 0, 1, 1], [], []>} : vector<16x128xbf16>, vector<128x128xbf16>, vector<16x128xf32> -> vector<16x128xf32>
    %c0_11 = arith.constant 0 : index
    %c0_12 = arith.constant 0 : index
    %23 = vector.load %arg4[%c0_11, %c0_12] : memref<1x128xf32, #tpu.memory_space<vmem>>, vector<1x128xf32>
    %24 = vector.broadcast %23 : vector<1x128xf32> to vector<16x128xf32>
    %25 = arith.addf %22, %24 : vector<16x128xf32>
    %cst_13 = arith.constant 0.000000e+00 : f32
    %26 = vector.broadcast %cst_13 : f32 to vector<16x128xf32>
    %27 = arith.maximumf %25, %26 : vector<16x128xf32>
    %28 = arith.truncf %27 : vector<16x128xf32> to vector<16x128xbf16>
    %c0_14 = arith.constant 0 : index
    %c0_15 = arith.constant 0 : index
    %29 = vector.load %arg5[%c0_14, %c0_15] : memref<128x128xbf16, #tpu.memory_space<vmem>>, vector<128x128xbf16>
    %cst_16 = arith.constant dense<0.000000e+00> : vector<16x128xf32>
    %30 = tpu.matmul %28, %29, %cst_16 {dimension_numbers = #tpu.dot_dimension_numbers<[1], [0], [0], [1], [0, 0, 1, 1], [], []>} : vector<16x128xbf16>, vector<128x128xbf16>, vector<16x128xf32> -> vector<16x128xf32>
    %c0_17 = arith.constant 0 : index
    %c0_18 = arith.constant 0 : index
    %31 = vector.load %arg6[%c0_17, %c0_18] : memref<1x128xf32, #tpu.memory_space<vmem>>, vector<1x128xf32>
    %32 = vector.broadcast %31 : vector<1x128xf32> to vector<16x128xf32>
    %33 = arith.addf %30, %32 : vector<16x128xf32>
    %34 = arith.truncf %33 : vector<16x128xf32> to vector<16x128xbf16>
    %cst_19 = arith.constant dense<0.000000e+00> : vector<8x128xf32>
    %35 = tpu.matmul %7, %34, %cst_19 {dimension_numbers = #tpu.dot_dimension_numbers<[1], [0], [0], [1], [0, 0, 1, 1], [], []>} : vector<8x16xbf16>, vector<16x128xbf16>, vector<8x128xf32> -> vector<8x128xf32>
    %36 = vector.broadcast %20 : vector<8x1xf32> to vector<8x128xf32>
    %37 = arith.mulf %35, %36 : vector<8x128xf32>
    %38 = arith.truncf %37 : vector<8x128xf32> to vector<8x128xbf16>
    %cst_20 = arith.constant dense<0.000000e+00> : vector<16x128xf32>
    %39 = tpu.matmul %14, %38, %cst_20 {dimension_numbers = #tpu.dot_dimension_numbers<[1], [0], [0], [1], [0, 0, 1, 1], [], []>} : vector<16x8xbf16>, vector<8x128xbf16>, vector<16x128xf32> -> vector<16x128xf32>
    %40 = arith.truncf %39 : vector<16x128xf32> to vector<16x128xbf16>
    %41 = tpu.concatenate %40, %0 in 1 : vector<16x128xbf16>, vector<16x128xbf16> -> vector<16x256xbf16>
    %c0_21 = arith.constant 0 : index
    %c0_22 = arith.constant 0 : index
    %c0_23 = arith.constant 0 : index
    %42 = vector.load %arg7[%c0_21, %c0_22, %c0_23] : memref<5x256x128xbf16, #tpu.memory_space<vmem>>, vector<1x256x128xbf16>
    %43 = vector.shape_cast %42 : vector<1x256x128xbf16> to vector<256x128xbf16>
    %cst_24 = arith.constant dense<0.000000e+00> : vector<16x128xf32>
    %44 = tpu.matmul %41, %43, %cst_24 {dimension_numbers = #tpu.dot_dimension_numbers<[1], [0], [0], [1], [0, 0, 1, 1], [], []>} : vector<16x256xbf16>, vector<256x128xbf16>, vector<16x128xf32> -> vector<16x128xf32>
    %c0_25 = arith.constant 0 : index
    %c0_26 = arith.constant 0 : index
    %c0_27 = arith.constant 0 : index
    %45 = vector.load %arg8[%c0_25, %c0_26, %c0_27] : memref<5x1x128xf32, #tpu.memory_space<vmem>>, vector<1x1x128xf32>
    %46 = vector.shape_cast %45 : vector<1x1x128xf32> to vector<1x128xf32>
    %47 = vector.broadcast %46 : vector<1x128xf32> to vector<16x128xf32>
    %48 = arith.addf %44, %47 : vector<16x128xf32>
    %cst_28 = arith.constant 0.000000e+00 : f32
    %49 = vector.broadcast %cst_28 : f32 to vector<16x128xf32>
    %50 = arith.maximumf %48, %49 : vector<16x128xf32>
    %51 = arith.truncf %50 : vector<16x128xf32> to vector<16x128xbf16>
    %c0_29 = arith.constant 0 : index
    %c0_30 = arith.constant 0 : index
    %c0_31 = arith.constant 0 : index
    %52 = vector.load %arg9[%c0_29, %c0_30, %c0_31] : memref<5x128x128xbf16, #tpu.memory_space<vmem>>, vector<1x128x128xbf16>
    %53 = vector.shape_cast %52 : vector<1x128x128xbf16> to vector<128x128xbf16>
    %cst_32 = arith.constant dense<0.000000e+00> : vector<16x128xf32>
    %54 = tpu.matmul %51, %53, %cst_32 {dimension_numbers = #tpu.dot_dimension_numbers<[1], [0], [0], [1], [0, 0, 1, 1], [], []>} : vector<16x128xbf16>, vector<128x128xbf16>, vector<16x128xf32> -> vector<16x128xf32>
    %c0_33 = arith.constant 0 : index
    %c0_34 = arith.constant 0 : index
    %c0_35 = arith.constant 0 : index
    %55 = vector.load %arg10[%c0_33, %c0_34, %c0_35] : memref<5x1x128xf32, #tpu.memory_space<vmem>>, vector<1x1x128xf32>
    %56 = vector.shape_cast %55 : vector<1x1x128xf32> to vector<1x128xf32>
    %57 = vector.broadcast %56 : vector<1x128xf32> to vector<16x128xf32>
    %58 = arith.addf %54, %57 : vector<16x128xf32>
    %59 = arith.truncf %58 : vector<16x128xf32> to vector<16x128xbf16>
    %cst_36 = arith.constant dense<0.000000e+00> : vector<8x128xf32>
    %60 = tpu.matmul %7, %59, %cst_36 {dimension_numbers = #tpu.dot_dimension_numbers<[1], [0], [0], [1], [0, 0, 1, 1], [], []>} : vector<8x16xbf16>, vector<16x128xbf16>, vector<8x128xf32> -> vector<8x128xf32>
    %61 = vector.broadcast %20 : vector<8x1xf32> to vector<8x128xf32>
    %62 = arith.mulf %60, %61 : vector<8x128xf32>
    %c0_37 = arith.constant 0 : index
    %c0_38 = arith.constant 0 : index
    %c0_39 = arith.constant 0 : index
    %63 = vector.load %arg11[%c0_37, %c0_38, %c0_39] : memref<5x128x128xbf16, #tpu.memory_space<vmem>>, vector<1x128x128xbf16>
    %64 = vector.shape_cast %63 : vector<1x128x128xbf16> to vector<128x128xbf16>
    %cst_40 = arith.constant dense<0.000000e+00> : vector<8x128xf32>
    %65 = tpu.matmul %38, %64, %cst_40 {dimension_numbers = #tpu.dot_dimension_numbers<[1], [0], [0], [1], [0, 0, 1, 1], [], []>} : vector<8x128xbf16>, vector<128x128xbf16>, vector<8x128xf32> -> vector<8x128xf32>
    %c0_41 = arith.constant 0 : index
    %c0_42 = arith.constant 0 : index
    %c0_43 = arith.constant 0 : index
    %66 = vector.load %arg12[%c0_41, %c0_42, %c0_43] : memref<5x1x128xf32, #tpu.memory_space<vmem>>, vector<1x1x128xf32>
    %67 = vector.shape_cast %66 : vector<1x1x128xf32> to vector<1x128xf32>
    %68 = vector.broadcast %67 : vector<1x128xf32> to vector<8x128xf32>
    %69 = arith.addf %65, %68 : vector<8x128xf32>
    %70 = arith.addf %69, %62 : vector<8x128xf32>
    %cst_44 = arith.constant 0.000000e+00 : f32
    %71 = vector.broadcast %cst_44 : f32 to vector<8x128xf32>
    %72 = arith.maximumf %70, %71 : vector<8x128xf32>
    %73 = arith.truncf %72 : vector<8x128xf32> to vector<8x128xbf16>
    %cst_45 = arith.constant dense<0.000000e+00> : vector<16x128xf32>
    %74 = tpu.matmul %14, %73, %cst_45 {dimension_numbers = #tpu.dot_dimension_numbers<[1], [0], [0], [1], [0, 0, 1, 1], [], []>} : vector<16x8xbf16>, vector<8x128xbf16>, vector<16x128xf32> -> vector<16x128xf32>
    %75 = arith.truncf %74 : vector<16x128xf32> to vector<16x128xbf16>
    %76 = tpu.concatenate %75, %0 in 1 : vector<16x128xbf16>, vector<16x128xbf16> -> vector<16x256xbf16>
    %c1 = arith.constant 1 : index
    %c0_46 = arith.constant 0 : index
    %c0_47 = arith.constant 0 : index
    %77 = vector.load %arg7[%c1, %c0_46, %c0_47] : memref<5x256x128xbf16, #tpu.memory_space<vmem>>, vector<1x256x128xbf16>
    %78 = vector.shape_cast %77 : vector<1x256x128xbf16> to vector<256x128xbf16>
    %cst_48 = arith.constant dense<0.000000e+00> : vector<16x128xf32>
    %79 = tpu.matmul %76, %78, %cst_48 {dimension_numbers = #tpu.dot_dimension_numbers<[1], [0], [0], [1], [0, 0, 1, 1], [], []>} : vector<16x256xbf16>, vector<256x128xbf16>, vector<16x128xf32> -> vector<16x128xf32>
    %c1_49 = arith.constant 1 : index
    %c0_50 = arith.constant 0 : index
    %c0_51 = arith.constant 0 : index
    %80 = vector.load %arg8[%c1_49, %c0_50, %c0_51] : memref<5x1x128xf32, #tpu.memory_space<vmem>>, vector<1x1x128xf32>
    %81 = vector.shape_cast %80 : vector<1x1x128xf32> to vector<1x128xf32>
    %82 = vector.broadcast %81 : vector<1x128xf32> to vector<16x128xf32>
    %83 = arith.addf %79, %82 : vector<16x128xf32>
    %cst_52 = arith.constant 0.000000e+00 : f32
    %84 = vector.broadcast %cst_52 : f32 to vector<16x128xf32>
    %85 = arith.maximumf %83, %84 : vector<16x128xf32>
    %86 = arith.truncf %85 : vector<16x128xf32> to vector<16x128xbf16>
    %c1_53 = arith.constant 1 : index
    %c0_54 = arith.constant 0 : index
    %c0_55 = arith.constant 0 : index
    %87 = vector.load %arg9[%c1_53, %c0_54, %c0_55] : memref<5x128x128xbf16, #tpu.memory_space<vmem>>, vector<1x128x128xbf16>
    %88 = vector.shape_cast %87 : vector<1x128x128xbf16> to vector<128x128xbf16>
    %cst_56 = arith.constant dense<0.000000e+00> : vector<16x128xf32>
    %89 = tpu.matmul %86, %88, %cst_56 {dimension_numbers = #tpu.dot_dimension_numbers<[1], [0], [0], [1], [0, 0, 1, 1], [], []>} : vector<16x128xbf16>, vector<128x128xbf16>, vector<16x128xf32> -> vector<16x128xf32>
    %c1_57 = arith.constant 1 : index
    %c0_58 = arith.constant 0 : index
    %c0_59 = arith.constant 0 : index
    %90 = vector.load %arg10[%c1_57, %c0_58, %c0_59] : memref<5x1x128xf32, #tpu.memory_space<vmem>>, vector<1x1x128xf32>
    %91 = vector.shape_cast %90 : vector<1x1x128xf32> to vector<1x128xf32>
    %92 = vector.broadcast %91 : vector<1x128xf32> to vector<16x128xf32>
    %93 = arith.addf %89, %92 : vector<16x128xf32>
    %94 = arith.truncf %93 : vector<16x128xf32> to vector<16x128xbf16>
    %cst_60 = arith.constant dense<0.000000e+00> : vector<8x128xf32>
    %95 = tpu.matmul %7, %94, %cst_60 {dimension_numbers = #tpu.dot_dimension_numbers<[1], [0], [0], [1], [0, 0, 1, 1], [], []>} : vector<8x16xbf16>, vector<16x128xbf16>, vector<8x128xf32> -> vector<8x128xf32>
    %96 = vector.broadcast %20 : vector<8x1xf32> to vector<8x128xf32>
    %97 = arith.mulf %95, %96 : vector<8x128xf32>
    %c1_61 = arith.constant 1 : index
    %c0_62 = arith.constant 0 : index
    %c0_63 = arith.constant 0 : index
    %98 = vector.load %arg11[%c1_61, %c0_62, %c0_63] : memref<5x128x128xbf16, #tpu.memory_space<vmem>>, vector<1x128x128xbf16>
    %99 = vector.shape_cast %98 : vector<1x128x128xbf16> to vector<128x128xbf16>
    %cst_64 = arith.constant dense<0.000000e+00> : vector<8x128xf32>
    %100 = tpu.matmul %73, %99, %cst_64 {dimension_numbers = #tpu.dot_dimension_numbers<[1], [0], [0], [1], [0, 0, 1, 1], [], []>} : vector<8x128xbf16>, vector<128x128xbf16>, vector<8x128xf32> -> vector<8x128xf32>
    %c1_65 = arith.constant 1 : index
    %c0_66 = arith.constant 0 : index
    %c0_67 = arith.constant 0 : index
    %101 = vector.load %arg12[%c1_65, %c0_66, %c0_67] : memref<5x1x128xf32, #tpu.memory_space<vmem>>, vector<1x1x128xf32>
    %102 = vector.shape_cast %101 : vector<1x1x128xf32> to vector<1x128xf32>
    %103 = vector.broadcast %102 : vector<1x128xf32> to vector<8x128xf32>
    %104 = arith.addf %100, %103 : vector<8x128xf32>
    %105 = arith.addf %104, %97 : vector<8x128xf32>
    %cst_68 = arith.constant 0.000000e+00 : f32
    %106 = vector.broadcast %cst_68 : f32 to vector<8x128xf32>
    %107 = arith.maximumf %105, %106 : vector<8x128xf32>
    %108 = arith.truncf %107 : vector<8x128xf32> to vector<8x128xbf16>
    %cst_69 = arith.constant dense<0.000000e+00> : vector<16x128xf32>
    %109 = tpu.matmul %14, %108, %cst_69 {dimension_numbers = #tpu.dot_dimension_numbers<[1], [0], [0], [1], [0, 0, 1, 1], [], []>} : vector<16x8xbf16>, vector<8x128xbf16>, vector<16x128xf32> -> vector<16x128xf32>
    %110 = arith.truncf %109 : vector<16x128xf32> to vector<16x128xbf16>
    %111 = tpu.concatenate %110, %0 in 1 : vector<16x128xbf16>, vector<16x128xbf16> -> vector<16x256xbf16>
    %c2 = arith.constant 2 : index
    %c0_70 = arith.constant 0 : index
    %c0_71 = arith.constant 0 : index
    %112 = vector.load %arg7[%c2, %c0_70, %c0_71] : memref<5x256x128xbf16, #tpu.memory_space<vmem>>, vector<1x256x128xbf16>
    %113 = vector.shape_cast %112 : vector<1x256x128xbf16> to vector<256x128xbf16>
    %cst_72 = arith.constant dense<0.000000e+00> : vector<16x128xf32>
    %114 = tpu.matmul %111, %113, %cst_72 {dimension_numbers = #tpu.dot_dimension_numbers<[1], [0], [0], [1], [0, 0, 1, 1], [], []>} : vector<16x256xbf16>, vector<256x128xbf16>, vector<16x128xf32> -> vector<16x128xf32>
    %c2_73 = arith.constant 2 : index
    %c0_74 = arith.constant 0 : index
    %c0_75 = arith.constant 0 : index
    %115 = vector.load %arg8[%c2_73, %c0_74, %c0_75] : memref<5x1x128xf32, #tpu.memory_space<vmem>>, vector<1x1x128xf32>
    %116 = vector.shape_cast %115 : vector<1x1x128xf32> to vector<1x128xf32>
    %117 = vector.broadcast %116 : vector<1x128xf32> to vector<16x128xf32>
    %118 = arith.addf %114, %117 : vector<16x128xf32>
    %cst_76 = arith.constant 0.000000e+00 : f32
    %119 = vector.broadcast %cst_76 : f32 to vector<16x128xf32>
    %120 = arith.maximumf %118, %119 : vector<16x128xf32>
    %121 = arith.truncf %120 : vector<16x128xf32> to vector<16x128xbf16>
    %c2_77 = arith.constant 2 : index
    %c0_78 = arith.constant 0 : index
    %c0_79 = arith.constant 0 : index
    %122 = vector.load %arg9[%c2_77, %c0_78, %c0_79] : memref<5x128x128xbf16, #tpu.memory_space<vmem>>, vector<1x128x128xbf16>
    %123 = vector.shape_cast %122 : vector<1x128x128xbf16> to vector<128x128xbf16>
    %cst_80 = arith.constant dense<0.000000e+00> : vector<16x128xf32>
    %124 = tpu.matmul %121, %123, %cst_80 {dimension_numbers = #tpu.dot_dimension_numbers<[1], [0], [0], [1], [0, 0, 1, 1], [], []>} : vector<16x128xbf16>, vector<128x128xbf16>, vector<16x128xf32> -> vector<16x128xf32>
    %c2_81 = arith.constant 2 : index
    %c0_82 = arith.constant 0 : index
    %c0_83 = arith.constant 0 : index
    %125 = vector.load %arg10[%c2_81, %c0_82, %c0_83] : memref<5x1x128xf32, #tpu.memory_space<vmem>>, vector<1x1x128xf32>
    %126 = vector.shape_cast %125 : vector<1x1x128xf32> to vector<1x128xf32>
    %127 = vector.broadcast %126 : vector<1x128xf32> to vector<16x128xf32>
    %128 = arith.addf %124, %127 : vector<16x128xf32>
    %129 = arith.truncf %128 : vector<16x128xf32> to vector<16x128xbf16>
    %cst_84 = arith.constant dense<0.000000e+00> : vector<8x128xf32>
    %130 = tpu.matmul %7, %129, %cst_84 {dimension_numbers = #tpu.dot_dimension_numbers<[1], [0], [0], [1], [0, 0, 1, 1], [], []>} : vector<8x16xbf16>, vector<16x128xbf16>, vector<8x128xf32> -> vector<8x128xf32>
    %131 = vector.broadcast %20 : vector<8x1xf32> to vector<8x128xf32>
    %132 = arith.mulf %130, %131 : vector<8x128xf32>
    %c2_85 = arith.constant 2 : index
    %c0_86 = arith.constant 0 : index
    %c0_87 = arith.constant 0 : index
    %133 = vector.load %arg11[%c2_85, %c0_86, %c0_87] : memref<5x128x128xbf16, #tpu.memory_space<vmem>>, vector<1x128x128xbf16>
    %134 = vector.shape_cast %133 : vector<1x128x128xbf16> to vector<128x128xbf16>
    %cst_88 = arith.constant dense<0.000000e+00> : vector<8x128xf32>
    %135 = tpu.matmul %108, %134, %cst_88 {dimension_numbers = #tpu.dot_dimension_numbers<[1], [0], [0], [1], [0, 0, 1, 1], [], []>} : vector<8x128xbf16>, vector<128x128xbf16>, vector<8x128xf32> -> vector<8x128xf32>
    %c2_89 = arith.constant 2 : index
    %c0_90 = arith.constant 0 : index
    %c0_91 = arith.constant 0 : index
    %136 = vector.load %arg12[%c2_89, %c0_90, %c0_91] : memref<5x1x128xf32, #tpu.memory_space<vmem>>, vector<1x1x128xf32>
    %137 = vector.shape_cast %136 : vector<1x1x128xf32> to vector<1x128xf32>
    %138 = vector.broadcast %137 : vector<1x128xf32> to vector<8x128xf32>
    %139 = arith.addf %135, %138 : vector<8x128xf32>
    %140 = arith.addf %139, %132 : vector<8x128xf32>
    %cst_92 = arith.constant 0.000000e+00 : f32
    %141 = vector.broadcast %cst_92 : f32 to vector<8x128xf32>
    %142 = arith.maximumf %140, %141 : vector<8x128xf32>
    %143 = arith.truncf %142 : vector<8x128xf32> to vector<8x128xbf16>
    %cst_93 = arith.constant dense<0.000000e+00> : vector<16x128xf32>
    %144 = tpu.matmul %14, %143, %cst_93 {dimension_numbers = #tpu.dot_dimension_numbers<[1], [0], [0], [1], [0, 0, 1, 1], [], []>} : vector<16x8xbf16>, vector<8x128xbf16>, vector<16x128xf32> -> vector<16x128xf32>
    %145 = arith.truncf %144 : vector<16x128xf32> to vector<16x128xbf16>
    %146 = tpu.concatenate %145, %0 in 1 : vector<16x128xbf16>, vector<16x128xbf16> -> vector<16x256xbf16>
    %c3 = arith.constant 3 : index
    %c0_94 = arith.constant 0 : index
    %c0_95 = arith.constant 0 : index
    %147 = vector.load %arg7[%c3, %c0_94, %c0_95] : memref<5x256x128xbf16, #tpu.memory_space<vmem>>, vector<1x256x128xbf16>
    %148 = vector.shape_cast %147 : vector<1x256x128xbf16> to vector<256x128xbf16>
    %cst_96 = arith.constant dense<0.000000e+00> : vector<16x128xf32>
    %149 = tpu.matmul %146, %148, %cst_96 {dimension_numbers = #tpu.dot_dimension_numbers<[1], [0], [0], [1], [0, 0, 1, 1], [], []>} : vector<16x256xbf16>, vector<256x128xbf16>, vector<16x128xf32> -> vector<16x128xf32>
    %c3_97 = arith.constant 3 : index
    %c0_98 = arith.constant 0 : index
    %c0_99 = arith.constant 0 : index
    %150 = vector.load %arg8[%c3_97, %c0_98, %c0_99] : memref<5x1x128xf32, #tpu.memory_space<vmem>>, vector<1x1x128xf32>
    %151 = vector.shape_cast %150 : vector<1x1x128xf32> to vector<1x128xf32>
    %152 = vector.broadcast %151 : vector<1x128xf32> to vector<16x128xf32>
    %153 = arith.addf %149, %152 : vector<16x128xf32>
    %cst_100 = arith.constant 0.000000e+00 : f32
    %154 = vector.broadcast %cst_100 : f32 to vector<16x128xf32>
    %155 = arith.maximumf %153, %154 : vector<16x128xf32>
    %156 = arith.truncf %155 : vector<16x128xf32> to vector<16x128xbf16>
    %c3_101 = arith.constant 3 : index
    %c0_102 = arith.constant 0 : index
    %c0_103 = arith.constant 0 : index
    %157 = vector.load %arg9[%c3_101, %c0_102, %c0_103] : memref<5x128x128xbf16, #tpu.memory_space<vmem>>, vector<1x128x128xbf16>
    %158 = vector.shape_cast %157 : vector<1x128x128xbf16> to vector<128x128xbf16>
    %cst_104 = arith.constant dense<0.000000e+00> : vector<16x128xf32>
    %159 = tpu.matmul %156, %158, %cst_104 {dimension_numbers = #tpu.dot_dimension_numbers<[1], [0], [0], [1], [0, 0, 1, 1], [], []>} : vector<16x128xbf16>, vector<128x128xbf16>, vector<16x128xf32> -> vector<16x128xf32>
    %c3_105 = arith.constant 3 : index
    %c0_106 = arith.constant 0 : index
    %c0_107 = arith.constant 0 : index
    %160 = vector.load %arg10[%c3_105, %c0_106, %c0_107] : memref<5x1x128xf32, #tpu.memory_space<vmem>>, vector<1x1x128xf32>
    %161 = vector.shape_cast %160 : vector<1x1x128xf32> to vector<1x128xf32>
    %162 = vector.broadcast %161 : vector<1x128xf32> to vector<16x128xf32>
    %163 = arith.addf %159, %162 : vector<16x128xf32>
    %164 = arith.truncf %163 : vector<16x128xf32> to vector<16x128xbf16>
    %cst_108 = arith.constant dense<0.000000e+00> : vector<8x128xf32>
    %165 = tpu.matmul %7, %164, %cst_108 {dimension_numbers = #tpu.dot_dimension_numbers<[1], [0], [0], [1], [0, 0, 1, 1], [], []>} : vector<8x16xbf16>, vector<16x128xbf16>, vector<8x128xf32> -> vector<8x128xf32>
    %166 = vector.broadcast %20 : vector<8x1xf32> to vector<8x128xf32>
    %167 = arith.mulf %165, %166 : vector<8x128xf32>
    %c3_109 = arith.constant 3 : index
    %c0_110 = arith.constant 0 : index
    %c0_111 = arith.constant 0 : index
    %168 = vector.load %arg11[%c3_109, %c0_110, %c0_111] : memref<5x128x128xbf16, #tpu.memory_space<vmem>>, vector<1x128x128xbf16>
    %169 = vector.shape_cast %168 : vector<1x128x128xbf16> to vector<128x128xbf16>
    %cst_112 = arith.constant dense<0.000000e+00> : vector<8x128xf32>
    %170 = tpu.matmul %143, %169, %cst_112 {dimension_numbers = #tpu.dot_dimension_numbers<[1], [0], [0], [1], [0, 0, 1, 1], [], []>} : vector<8x128xbf16>, vector<128x128xbf16>, vector<8x128xf32> -> vector<8x128xf32>
    %c3_113 = arith.constant 3 : index
    %c0_114 = arith.constant 0 : index
    %c0_115 = arith.constant 0 : index
    %171 = vector.load %arg12[%c3_113, %c0_114, %c0_115] : memref<5x1x128xf32, #tpu.memory_space<vmem>>, vector<1x1x128xf32>
    %172 = vector.shape_cast %171 : vector<1x1x128xf32> to vector<1x128xf32>
    %173 = vector.broadcast %172 : vector<1x128xf32> to vector<8x128xf32>
    %174 = arith.addf %170, %173 : vector<8x128xf32>
    %175 = arith.addf %174, %167 : vector<8x128xf32>
    %cst_116 = arith.constant 0.000000e+00 : f32
    %176 = vector.broadcast %cst_116 : f32 to vector<8x128xf32>
    %177 = arith.maximumf %175, %176 : vector<8x128xf32>
    %178 = arith.truncf %177 : vector<8x128xf32> to vector<8x128xbf16>
    %cst_117 = arith.constant dense<0.000000e+00> : vector<16x128xf32>
    %179 = tpu.matmul %14, %178, %cst_117 {dimension_numbers = #tpu.dot_dimension_numbers<[1], [0], [0], [1], [0, 0, 1, 1], [], []>} : vector<16x8xbf16>, vector<8x128xbf16>, vector<16x128xf32> -> vector<16x128xf32>
    %180 = arith.truncf %179 : vector<16x128xf32> to vector<16x128xbf16>
    %181 = tpu.concatenate %180, %0 in 1 : vector<16x128xbf16>, vector<16x128xbf16> -> vector<16x256xbf16>
    %c4 = arith.constant 4 : index
    %c0_118 = arith.constant 0 : index
    %c0_119 = arith.constant 0 : index
    %182 = vector.load %arg7[%c4, %c0_118, %c0_119] : memref<5x256x128xbf16, #tpu.memory_space<vmem>>, vector<1x256x128xbf16>
    %183 = vector.shape_cast %182 : vector<1x256x128xbf16> to vector<256x128xbf16>
    %cst_120 = arith.constant dense<0.000000e+00> : vector<16x128xf32>
    %184 = tpu.matmul %181, %183, %cst_120 {dimension_numbers = #tpu.dot_dimension_numbers<[1], [0], [0], [1], [0, 0, 1, 1], [], []>} : vector<16x256xbf16>, vector<256x128xbf16>, vector<16x128xf32> -> vector<16x128xf32>
    %c4_121 = arith.constant 4 : index
    %c0_122 = arith.constant 0 : index
    %c0_123 = arith.constant 0 : index
    %185 = vector.load %arg8[%c4_121, %c0_122, %c0_123] : memref<5x1x128xf32, #tpu.memory_space<vmem>>, vector<1x1x128xf32>
    %186 = vector.shape_cast %185 : vector<1x1x128xf32> to vector<1x128xf32>
    %187 = vector.broadcast %186 : vector<1x128xf32> to vector<16x128xf32>
    %188 = arith.addf %184, %187 : vector<16x128xf32>
    %cst_124 = arith.constant 0.000000e+00 : f32
    %189 = vector.broadcast %cst_124 : f32 to vector<16x128xf32>
    %190 = arith.maximumf %188, %189 : vector<16x128xf32>
    %191 = arith.truncf %190 : vector<16x128xf32> to vector<16x128xbf16>
    %c4_125 = arith.constant 4 : index
    %c0_126 = arith.constant 0 : index
    %c0_127 = arith.constant 0 : index
    %192 = vector.load %arg9[%c4_125, %c0_126, %c0_127] : memref<5x128x128xbf16, #tpu.memory_space<vmem>>, vector<1x128x128xbf16>
    %193 = vector.shape_cast %192 : vector<1x128x128xbf16> to vector<128x128xbf16>
    %cst_128 = arith.constant dense<0.000000e+00> : vector<16x128xf32>
    %194 = tpu.matmul %191, %193, %cst_128 {dimension_numbers = #tpu.dot_dimension_numbers<[1], [0], [0], [1], [0, 0, 1, 1], [], []>} : vector<16x128xbf16>, vector<128x128xbf16>, vector<16x128xf32> -> vector<16x128xf32>
    %c4_129 = arith.constant 4 : index
    %c0_130 = arith.constant 0 : index
    %c0_131 = arith.constant 0 : index
    %195 = vector.load %arg10[%c4_129, %c0_130, %c0_131] : memref<5x1x128xf32, #tpu.memory_space<vmem>>, vector<1x1x128xf32>
    %196 = vector.shape_cast %195 : vector<1x1x128xf32> to vector<1x128xf32>
    %197 = vector.broadcast %196 : vector<1x128xf32> to vector<16x128xf32>
    %198 = arith.addf %194, %197 : vector<16x128xf32>
    %199 = arith.truncf %198 : vector<16x128xf32> to vector<16x128xbf16>
    %cst_132 = arith.constant dense<0.000000e+00> : vector<8x128xf32>
    %200 = tpu.matmul %7, %199, %cst_132 {dimension_numbers = #tpu.dot_dimension_numbers<[1], [0], [0], [1], [0, 0, 1, 1], [], []>} : vector<8x16xbf16>, vector<16x128xbf16>, vector<8x128xf32> -> vector<8x128xf32>
    %201 = vector.broadcast %20 : vector<8x1xf32> to vector<8x128xf32>
    %202 = arith.mulf %200, %201 : vector<8x128xf32>
    %c4_133 = arith.constant 4 : index
    %c0_134 = arith.constant 0 : index
    %c0_135 = arith.constant 0 : index
    %203 = vector.load %arg11[%c4_133, %c0_134, %c0_135] : memref<5x128x128xbf16, #tpu.memory_space<vmem>>, vector<1x128x128xbf16>
    %204 = vector.shape_cast %203 : vector<1x128x128xbf16> to vector<128x128xbf16>
    %cst_136 = arith.constant dense<0.000000e+00> : vector<8x128xf32>
    %205 = tpu.matmul %178, %204, %cst_136 {dimension_numbers = #tpu.dot_dimension_numbers<[1], [0], [0], [1], [0, 0, 1, 1], [], []>} : vector<8x128xbf16>, vector<128x128xbf16>, vector<8x128xf32> -> vector<8x128xf32>
    %c4_137 = arith.constant 4 : index
    %c0_138 = arith.constant 0 : index
    %c0_139 = arith.constant 0 : index
    %206 = vector.load %arg12[%c4_137, %c0_138, %c0_139] : memref<5x1x128xf32, #tpu.memory_space<vmem>>, vector<1x1x128xf32>
    %207 = vector.shape_cast %206 : vector<1x1x128xf32> to vector<1x128xf32>
    %208 = vector.broadcast %207 : vector<1x128xf32> to vector<8x128xf32>
    %209 = arith.addf %205, %208 : vector<8x128xf32>
    %210 = arith.addf %209, %202 : vector<8x128xf32>
    %211 = arith.truncf %210 : vector<8x128xf32> to vector<8x128xbf16>
    %c0_140 = arith.constant 0 : index
    %c0_141 = arith.constant 0 : index
    %212 = vector.load %arg13[%c0_140, %c0_141] : memref<128x128xbf16, #tpu.memory_space<vmem>>, vector<128x128xbf16>
    %cst_142 = arith.constant dense<0.000000e+00> : vector<8x128xf32>
    %213 = tpu.matmul %211, %212, %cst_142 {dimension_numbers = #tpu.dot_dimension_numbers<[1], [0], [0], [1], [0, 0, 1, 1], [], []>} : vector<8x128xbf16>, vector<128x128xbf16>, vector<8x128xf32> -> vector<8x128xf32>
    %c0_143 = arith.constant 0 : index
    %c0_144 = arith.constant 0 : index
    %214 = vector.load %arg14[%c0_143, %c0_144] : memref<1x128xf32, #tpu.memory_space<vmem>>, vector<1x128xf32>
    %215 = vector.broadcast %214 : vector<1x128xf32> to vector<8x128xf32>
    %216 = arith.addf %213, %215 : vector<8x128xf32>
    %cst_145 = arith.constant 0.000000e+00 : f32
    %217 = vector.broadcast %cst_145 : f32 to vector<8x128xf32>
    %218 = arith.maximumf %216, %217 : vector<8x128xf32>
    %219 = arith.truncf %218 : vector<8x128xf32> to vector<8x128xbf16>
    %c0_146 = arith.constant 0 : index
    %c0_147 = arith.constant 0 : index
    %220 = vector.load %arg15[%c0_146, %c0_147] : memref<128x128xbf16, #tpu.memory_space<vmem>>, vector<128x128xbf16>
    %cst_148 = arith.constant dense<0.000000e+00> : vector<8x128xf32>
    %221 = tpu.matmul %219, %220, %cst_148 {dimension_numbers = #tpu.dot_dimension_numbers<[1], [0], [0], [1], [0, 0, 1, 1], [], []>} : vector<8x128xbf16>, vector<128x128xbf16>, vector<8x128xf32> -> vector<8x128xf32>
    %c0_149 = arith.constant 0 : index
    %c0_150 = arith.constant 0 : index
    %222 = vector.load %arg16[%c0_149, %c0_150] : memref<1x128xf32, #tpu.memory_space<vmem>>, vector<1x128xf32>
    %223 = vector.broadcast %222 : vector<1x128xf32> to vector<8x128xf32>
    %224 = arith.addf %221, %223 : vector<8x128xf32>
    %225 = vector.extract_strided_slice %224 {offsets = [0, 0], sizes = [8, 1], strides = [1, 1]} : vector<8x128xf32> to vector<8x1xf32>
    %c0_151 = arith.constant 0 : index
    %c0_152 = arith.constant 0 : index
    %226 = vector.load %arg17[%c0_151, %c0_152] : memref<8x1xf32, #tpu.memory_space<vmem>>, vector<8x1xf32>
    tpu.vector_store %arg17[%c0_151, %c0_152], %225 {strides = array<i32>} : memref<8x1xf32, #tpu.memory_space<vmem>>, vector<8x1xf32>,
    return
  }
}

</mosaic_0001>

<bundles_post_ra>
// kernel: _forward_jit.1
= control target key start
LH: loop header
LB: loop body
LE: loop exit
PB: predicated region body
PF: predicated region fallthrough
CT: control target
= control target key end

     0   :  { %s4969_s0 = inlined_call_operand.vmem [shape: s32[16,1], index: 0, kind: input, shape index: {}]   ;;  %s4970_s1 = inlined_call_operand.vmem [shape: s32[1,16], index: 1, kind: input, shape index: {}]   ;;  %s4971_s2 = inlined_call_operand.vmem [shape: bf16[16,128], index: 2, kind: input, shape index: {}]   ;;  %s4972_s3 = inlined_call_operand.vmem [shape: bf16[128,128], index: 3, kind: input, shape index: {}]   ;;  %s4973_s4 = inlined_call_operand.hbm [shape: f32[1,128], index: 4, kind: input, shape index: {}]   ;;  %s4974_s5 = inlined_call_operand.hbm [shape: bf16[128,128], index: 5, kind: input, shape index: {}]   ;;  %s4975_s6 = inlined_call_operand.hbm [shape: f32[1,128], index: 6, kind: input, shape index: {}]   ;;  %s4976_s7 = inlined_call_operand.hbm [shape: bf16[5,256,128], index: 7, kind: input, shape index: {}]   ;;  %s4977_s8 = inlined_call_operand.vmem [shape: f32[5,1,128], index: 8, kind: input, shape index: {}]   ;;  %s4978_s9 = inlined_call_operand.hbm [shape: bf16[5,128,128], index: 9, kind: input, shape index: {}]   ;;  %s4979_s10 = inlined_call_operand.vmem [shape: f32[5,1,128], index: 10, kind: input, shape index: {}]   ;;  %s4980_s11 = inlined_call_operand.hbm [shape: bf16[5,128,128], index: 11, kind: input, shape index: {}]   ;;  %s4981_s12 = inlined_call_operand.vmem [shape: f32[5,1,128], index: 12, kind: input, shape index: {}]   ;;  %s4982_s13 = inlined_call_operand.hbm [shape: bf16[128,128], index: 13, kind: input, shape index: {}]   ;;  %s4983_s14 = inlined_call_operand.vmem [shape: f32[1,128], index: 14, kind: input, shape index: {}]   ;;  %s4984_s15 = inlined_call_operand.hbm [shape: bf16[128,128], index: 15, kind: input, shape index: {}]   ;;  %s4985_s16 = inlined_call_operand.vmem [shape: f32[1,128], index: 16, kind: input, shape index: {}]   ;;  %s4986_s17 = inlined_call_operand.vmem [shape: f32[8,1], index: 17, kind: output, shape index: {}]  }
   0x1   :  { %4988 = sst [smem:[#allocation20_spill]] %s4969_s0 }
   0x2   :  { %4989 = sst [smem:[#allocation21_spill]] %s4970_s1 }
   0x3   :  { %22 = vsyncpa [#allocation3], 0 }
   0x4   :  { %23 = vsyncpa [#allocation5], 0 }
   0x5   :  { %24 = vsyncpa [#allocation8], 0 }
   0x6   :  { %25 = vsyncpa [#allocation11], 0 }
   0x7   :  { %26 = vsyncpa [#allocation14], 0  ;;  %s4478_s24 = smov [#allocation4]  }
   0x8   :  { %s50_s25 = sshll.u32 %s4478_s24, 4  ;;  %s51_s25 = int_to_ptr.vmem [resolvable:$true] %s50_s25 }
   0x9   :  { %s4316_s26 = scalar_lea.vmem %s51_s25, 1024  ;;  %p4321_p1 = scmp.lt.s32.totalorder %s51_s25, %s51_s25 }
   0xa   :  { %p4317_p0 = scmp.ne.s32.totalorder %s51_s25, %s4316_s26  ;;  %p4322_p2 = scmp.lt.s32.totalorder %s4316_s26, %s4316_s26 }
   0xc   :  { %p4323_p3 = por %p4322_p2, %p4321_p1 }
   0xe   :  { %p4324_p4 = pnand %p4323_p3, %p4317_p0 }
  0x10   :  { %4327 = shalt.err (!%p4324_p4)
}
  0x11   :  { %s4479_s27 = smov 64   ;;  %s4480_s28 = smov 4  }
  0x12   :  { %56 = dma.hbm_to_vmem [thread:$0]  %s4974_s5, 1024, %s51_s25, [#allocation5], %s4479_s27, %s4479_s27, %s4480_s28  }
  0x13   :  { %s4481_s30 = smov [#allocation7]   ;;  %s4482_s19 = smov [#allocation10]  }
  0x14   :  { %s72_s18 = sshll.u32 %s4481_s30, 4  ;;  %s100_s1 = sshll.u32 %s4482_s19, 4  ;;  %s73_s18 = int_to_ptr.vmem [resolvable:$true] %s72_s18  ;;  %s101_s1 = int_to_ptr.vmem [resolvable:$true] %s100_s1 }
  0x15   :  { %s4336_s20 = scalar_lea.vmem %s73_s18, 10240  ;;  %p4341_p6 = scmp.lt.s32.totalorder %s73_s18, %s73_s18 }
  0x16   :  { %p4337_p5 = scmp.ne.s32.totalorder %s73_s18, %s4336_s20  ;;  %p4342_p7 = scmp.lt.s32.totalorder %s4336_s20, %s4336_s20 }
  0x18   :  { %p4343_p8 = por %p4342_p7, %p4341_p6 }
  0x1a   :  { %p4344_p9 = pnand %p4343_p8, %p4337_p5 }
  0x1c   :  { %4347 = shalt.err (!%p4344_p9)
}
  0x1d   :  { %78 = dma.hbm_to_vmem [thread:$0]  %s4976_s7, 10240, %s73_s18, [#allocation8], %s4479_s27, %s4479_s27, %s4480_s28  }
  0x1e   :  { %s4356_s5 = scalar_lea.vmem %s101_s1, 5120  ;;  %p4361_p11 = scmp.lt.s32.totalorder %s101_s1, %s101_s1 }
  0x1f   :  { %p4357_p10 = scmp.ne.s32.totalorder %s101_s1, %s4356_s5  ;;  %p4362_p12 = scmp.lt.s32.totalorder %s4356_s5, %s4356_s5 }
  0x21   :  { %p4363_p13 = por %p4362_p12, %p4361_p11 }
  0x23   :  { %p4364_p0 = pnand %p4363_p13, %p4357_p10 }
  0x25   :  { %4367 = shalt.err (!%p4364_p0)
}
  0x26   :  { %106 = dma.hbm_to_vmem [thread:$0]  %s4980_s11, 5120, %s101_s1, [#allocation11], %s4479_s27, %s4479_s27, %s4480_s28  }
  0x27   :  { %s4483_s25 = smov [#allocation2]   ;;  %s4484_s29 = smov [#allocation6]  }
  0x28   :  { %s41_s26 = sshll.u32 %s4483_s25, 4  ;;  %s63_s7 = sshll.u32 %s4484_s29, 4  ;;  %s42_s26 = int_to_ptr.vmem [resolvable:$true] %s41_s26  ;;  %s64_s7 = int_to_ptr.vmem [resolvable:$true] %s63_s7 }
  0x29   :  { %s4376_s0 = scalar_lea.vmem %s42_s26, 16  ;;  %s4380_s30 = scalar_lea.vmem %s42_s26, 32 }
  0x2a   :  { %p4377_p1 = scmp.ne.s32.totalorder %s42_s26, %s4376_s0  ;;  %p4381_p2 = scmp.lt.s32.totalorder %s42_s26, %s42_s26 }
  0x2b   :  { %p4382_p3 = scmp.lt.s32.totalorder %s4380_s30, %s4376_s0 }
  0x2d   :  { %p4383_p4 = por %p4382_p3, %p4381_p2 }
  0x2f   :  { %p4384_p5 = pnand %p4383_p4, %p4377_p1 }
  0x31   :  { %4387 = shalt.err (!%p4384_p5)
}
  0x32   :  { %44 = dma.hbm_to_vmem [thread:$0]  %s4973_s4, 16, %s42_s26, [#allocation3]  }
  0x33   :  { %s4396_s20 = scalar_lea.vmem %s64_s7, 16  ;;  %s4400_s11 = scalar_lea.vmem %s64_s7, 32 }
  0x34   :  { %p4397_p6 = scmp.ne.s32.totalorder %s64_s7, %s4396_s20  ;;  %p4401_p7 = scmp.lt.s32.totalorder %s64_s7, %s64_s7 }
  0x35   :  { %p4402_p8 = scmp.lt.s32.totalorder %s4400_s11, %s4396_s20 }
  0x37   :  { %p4403_p9 = por %p4402_p8, %p4401_p7 }
  0x39   :  { %p4404_p10 = pnand %p4403_p9, %p4397_p6 }
  0x3b   :  { %4407 = shalt.err (!%p4404_p10)
}
  0x3c   :  { %66 = dma.hbm_to_vmem [thread:$0]  %s4975_s6, 16, %s64_s7, [#allocation5]  }
  0x3d   :  { %s4485_s22 = smov [#allocation9]   ;;  %s4486_s23 = smov [#allocation12]  }
  0x3e   :  { %s86_s5 = sshll.u32 %s4485_s22, 4  ;;  %s114_s24 = sshll.u32 %s4486_s23, 4  ;;  %s87_s5 = int_to_ptr.vmem [resolvable:$true] %s86_s5  ;;  %s115_s24 = int_to_ptr.vmem [resolvable:$true] %s114_s24 }
  0x3f   :  { %s4416_s25 = scalar_lea.vmem %s87_s5, 5120  ;;  %p4421_p12 = scmp.lt.s32.totalorder %s87_s5, %s87_s5 }
  0x40   :  { %p4417_p11 = scmp.ne.s32.totalorder %s87_s5, %s4416_s25  ;;  %p4422_p13 = scmp.lt.s32.totalorder %s4416_s25, %s4416_s25 }
  0x42   :  { %p4423_p0 = por %p4422_p13, %p4421_p12 }
  0x44   :  { %p4424_p1 = pnand %p4423_p0, %p4417_p11 }
  0x46   :  { %4427 = shalt.err (!%p4424_p1)
}
  0x47   :  { %92 = dma.hbm_to_vmem [thread:$0]  %s4978_s9, 5120, %s87_s5, [#allocation8], %s4479_s27, %s4479_s27, %s4480_s28  }
  0x48   :  { %s4436_s6 = scalar_lea.vmem %s115_s24, 1024  ;;  %p4441_p3 = scmp.lt.s32.totalorder %s115_s24, %s115_s24 }
  0x49   :  { %p4437_p2 = scmp.ne.s32.totalorder %s115_s24, %s4436_s6  ;;  %p4442_p4 = scmp.lt.s32.totalorder %s4436_s6, %s4436_s6 }
  0x4b   :  { %p4443_p5 = por %p4442_p4, %p4441_p3 }
  0x4d   :  { %p4444_p6 = pnand %p4443_p5, %p4437_p2 }
  0x4f   :  { %4447 = shalt.err (!%p4444_p6)
}
  0x50   :  { %120 = dma.hbm_to_vmem [thread:$0]  %s4982_s13, 1024, %s115_s24, [#allocation11], %s4479_s27, %s4479_s27, %s4480_s28  }
  0x51   :  { %s4487_s0 = smov [#allocation13]  }
  0x52   :  { %s128_s30 = sshll.u32 %s4487_s0, 4  ;;  %s129_s30 = int_to_ptr.vmem [resolvable:$true] %s128_s30 }
  0x53   :  { %s4456_s18 = scalar_lea.vmem %s129_s30, 1024  ;;  %p4461_p8 = scmp.lt.s32.totalorder %s129_s30, %s129_s30 }
  0x54   :  { %p4457_p7 = scmp.ne.s32.totalorder %s129_s30, %s4456_s18  ;;  %p4462_p9 = scmp.lt.s32.totalorder %s4456_s18, %s4456_s18 }
  0x56   :  { %p4463_p10 = por %p4462_p9, %p4461_p8 }
  0x58   :  { %p4464_p11 = pnand %p4463_p10, %p4457_p7 }
  0x5a   :  { %4467 = shalt.err (!%p4464_p11)
}
  0x5b   :  { %134 = dma.hbm_to_vmem [thread:$0]  %s4984_s15, 1024, %s129_s30, [#allocation14], %s4479_s27, %s4479_s27, %s4480_s28  }
  0x5c   :  { %4468 = dma.done.wait [#allocation3], 16  }
  0x5d   :  { %4469 = vsyncadd [#allocation3], 4294967280 }
  0x5e   :  { %4470 = dma.done.wait [#allocation5], 1040  }
  0x5f   :  { %4471 = vsyncadd [#allocation5], 4294966256 }
  0x60   :  { %4472 = dma.done.wait [#allocation8], 15360  }
  0x61   :  { %4473 = vsyncadd [#allocation8], 4294951936 }
  0x62   :  { %4474 = dma.done.wait [#allocation11], 6144  }
  0x63   :  { %4475 = vsyncadd [#allocation11], 4294961152 }
  0x64   :  { %4476 = dma.done.wait [#allocation14], 1024  }
  0x65   :  { %4477 = vsyncadd [#allocation14], 4294966272  ;;  %v165_v0 = vlaneseq  ;;  %v4488_v1 = vmov 0.0   ;;  %vm4489_vm0 = vmmov 0   ;;  %v4490_v2 = vmov 1065369472  }
  0x66   :  { %3744 = vmatprep.subr.bf16.mxu1 %v4488_v1  ;;  %3746 = vmatprep.mubr.msk.bf16.mxu1 %vm4489_vm0, %v4488_v1  ;;  %s4990_s27 = sld [smem:[#allocation21_spill]]  ;;  %vm193_vm2 = vcmask 130048   ;;  %v4112_v6 = vld [vmem:[%s4972_s3 + $0x38] sm:$0xff]   ;;  %v4113_v8 = vld [vmem:[%s4972_s3 + $0x30] sm:$0xff]   ;;  %v4114_v9 = vld [vmem:[%s4972_s3 + $0x28] sm:$0xff]   ;;  %v4491_v18 = vmov 0  }
  0x67   :  { %3745 = vmatpush3.bf16.msra.mxu1 %v4490_v2  ;;  %3770 = vmatprep.subr.bf16.mxu0 %v4488_v1  ;;  %v166_v3 = vshrl.u32 %v165_v0, 7  ;;  %v4115_v10 = vld [vmem:[%s4972_s3 + $0x20] sm:$0xff]   ;;  %v4116_v11 = vld [vmem:[%s4972_s3 + $0x18] sm:$0xff]   ;;  %v4117_v12 = vld [vmem:[%s4972_s3 + $0x10] sm:$0xff]   ;;  %s4991_s19 = sld [smem:[#allocation20_spill]]  ;;  %v177_v52 = vand.u32 127, %v165_v0 }
  0x68   :  { %3750 = vmatprep.subr.bf16.mxu1 %v4488_v1  ;;  %3786 = vmatprep.mubr.msk.bf16.mxu0 %vm4489_vm0, %v4488_v1  ;;  %v4118_v13 = vld [vmem:[%s4972_s3 + $0x8] sm:$0xff]   ;;  %v4119_v14 = vld [vmem:[%s4972_s3] sm:$0xff]   ;;  %v4123_v19 = vld [vmem:[#allocation4 + $0x28] sm:$0xff]   ;;  %vm525_vm5 = vcmask 1043456   ;;  %vm521_vm6 = vcmask 64512   ;;  %vm3233_vm7 = vcmask 7168  }
  0x69   :  { %v4676_v15 = vld [vmem:[%s4971_s2] sm:$0xff]   ;;  %4110 = vset.pattern.permute.xlu0 %v4491_v18  ;;  %4111 = vset.pattern.permute.xlu1 %v4491_v18  ;;  %v4124_v20 = vld [vmem:[#allocation4 + $0x20] sm:$0xff]   ;;  %v4127_v23 = vld [vmem:[#allocation4 + $0x8] sm:$0xff]  }
  0x6a   :  { %v4121_v16 = vld [vmem:[#allocation4 + $0x38] sm:$0xff]   ;;  %v4122_v17 = vld [vmem:[#allocation4 + $0x30] sm:$0xff]   ;;  %v4128_v24 = vld [vmem:[#allocation4] sm:$0xff]  }
  0x6b   :  { %3771 = vmatpush3.bf16.msra.mxu0 %v4121_v16  ;;  %v4125_v21 = vld [vmem:[#allocation4 + $0x18] sm:$0xff]   ;;  %v4126_v22 = vld [vmem:[#allocation4 + $0x10] sm:$0xff]   ;;  %v3259_v44 = vld [vmem:[#allocation6] ss:$0 sm:$0xff] }
  0x6c   :  { %v3244_v4 = vld [vmem:[%s4990_s27] ss:$0 sm:$0xff]  ;;  %3772 = vmatprep.subr.bf16.mxu0 %v4488_v1  ;;  %v3249_v31 = vld [vmem:[#allocation2] ss:$0 sm:$0xff]  ;;  %v4141_v16 = vld [vmem:[#allocation7 + $0x48] sm:$0xff]  }
  0x6d   :  { %vm172_vm1 = vcmp.eq.s32.totalorder %v166_v3, %v3244_v4  ;;  %v179_v41 = vld [vmem:[%s4991_s19 + $0x8] sm:$0xff]  ;;  %v178_v42 = vld [vmem:[%s4991_s19] sm:$0xff] }
  0x6e   :  { %v3245_v5 = vsel %vm172_vm1, 1.0, %v4488_v1  ;;  %184 = vperm.xlu1 %4111, %v179_v41   ;;  %v4129_v59 = vld [vmem:[#allocation7 + $0x78] sm:$0xff]   ;;  %v4131_v4 = vld [vmem:[#allocation7 + $0x70] sm:$0xff]   ;;  %v4144_v18 = vld [vmem:[#allocation7] sm:$0xff]  }
  0x6f   :  { %v4639_v7 = vpack.c.bf16 %v3245_v5, %v3245_v5  ;;  %3773 = vmatpush3.bf16.msra.mxu0 %v4122_v17  ;;  %v4130_v2 = vld [vmem:[#allocation7 + $0x38] sm:$0xff]   ;;  %v4132_v5 = vld [vmem:[#allocation7 + $0x30] sm:$0xff]   ;;  %v4143_v17 = vld [vmem:[#allocation7 + $0x40] sm:$0xff]  }
  0x70   :  { %3774 = vmatprep.subr.bf16.mxu0 %v4488_v1 }
  0x71   :  { %3747 = vmatmul.mubr.msk.bf16.vlgmr.msra.gmra.mxu1 %vm193_vm2, %v4639_v7 }
  0x72   :  { %3751 = vmatpush3.bf16.msra.mxu1 %v4112_v6  ;;  %3766 = vmatprep.mubr.msk.bf16.mxu1 %vm4489_vm0, %v4488_v1  ;;  %v4133_v6 = vld [vmem:[#allocation7 + $0x68] sm:$0xff]  }
  0x73   :  { %3752 = vmatprep.subr.bf16.mxu1 %v4488_v1  ;;  %3775 = vmatpush3.bf16.msra.mxu0 %v4123_v19  ;;  %v4145_v19 = vld [vmem:[#allocation9 + $0x38] sm:$0xff]  }
  0x74   :  { %3776 = vmatprep.subr.bf16.mxu0 %v4488_v1 }
  0x76   :  { %3753 = vmatpush3.bf16.msra.mxu1 %v4113_v8  ;;  %v4134_v8 = vld [vmem:[#allocation7 + $0x28] sm:$0xff]  }
  0x77   :  { %3754 = vmatprep.subr.bf16.mxu1 %v4488_v1  ;;  %3777 = vmatpush3.bf16.msra.mxu0 %v4124_v20  ;;  %v4146_v20 = vld [vmem:[#allocation9 + $0x30] sm:$0xff]  }
  0x78   :  { %3778 = vmatprep.subr.bf16.mxu0 %v4488_v1 }
  0x7a   :  { %3755 = vmatpush3.bf16.msra.mxu1 %v4114_v9  ;;  %v4135_v9 = vld [vmem:[#allocation7 + $0x60] sm:$0xff]  }
  0x7b   :  { %3756 = vmatprep.subr.bf16.mxu1 %v4488_v1  ;;  %3779 = vmatpush3.bf16.msra.mxu0 %v4125_v21  ;;  %v4147_v21 = vld [vmem:[#allocation9 + $0x28] sm:$0xff]  }
  0x7c   :  { %3780 = vmatprep.subr.bf16.mxu0 %v4488_v1 }
  0x7e   :  { %3757 = vmatpush3.bf16.msra.mxu1 %v4115_v10  ;;  %v4136_v10 = vld [vmem:[#allocation7 + $0x20] sm:$0xff]  }
  0x7f   :  { %3758 = vmatprep.subr.bf16.mxu1 %v4488_v1  ;;  %3781 = vmatpush3.bf16.msra.mxu0 %v4126_v22  ;;  %v4148_v22 = vld [vmem:[#allocation9 + $0x20] sm:$0xff]  }
  0x80   :  { %3782 = vmatprep.subr.bf16.mxu0 %v4488_v1 }
  0x82   :  { %3759 = vmatpush3.bf16.msra.mxu1 %v4116_v11  ;;  %v4137_v11 = vld [vmem:[#allocation7 + $0x58] sm:$0xff]  }
  0x83   :  { %3760 = vmatprep.subr.bf16.mxu1 %v4488_v1  ;;  %3783 = vmatpush3.bf16.msra.mxu0 %v4127_v23  ;;  %v4149_v23 = vld [vmem:[#allocation9 + $0x18] sm:$0xff]  }
  0x84   :  { %3784 = vmatprep.subr.bf16.mxu0 %v4488_v1 }
  0x86   :  { %3761 = vmatpush3.bf16.msra.mxu1 %v4117_v12  ;;  %v4138_v12 = vld [vmem:[#allocation7 + $0x18] sm:$0xff]  }
  0x87   :  { %3762 = vmatprep.subr.bf16.mxu1 %v4488_v1  ;;  %3785 = vmatpush3.bf16.msra.mxu0 %v4128_v24 }
  0x88   :  { %3802 = vmatprep.subr.bf16.mxu0 %v4488_v1 }
  0x8a   :  { %3763 = vmatpush3.bf16.msra.mxu1 %v4118_v13  ;;  %v4139_v13 = vld [vmem:[#allocation7 + $0x50] sm:$0xff]  }
  0x8b   :  { %3764 = vmatprep.subr.bf16.mxu1 %v4488_v1 }
  0x8e   :  { %3765 = vmatpush3.bf16.msra.mxu1 %v4119_v14  ;;  %v4140_v14 = vld [vmem:[#allocation7 + $0x10] sm:$0xff]  }
  0x8f   :  { %3790 = vmatprep.subr.bf16.mxu1 %v4488_v1 }
  0x91   :  { %3767 = vmatmul.mubr.bf16.vlgmr.msra.gmra.mxu1 %v4676_v15 }
  0x92   :  { %3792 = vmatprep.mubr.msk.bf16.mxu1 %vm4489_vm0, %v4488_v1 }
  0xe9   :  { %v185_v53 = vpop.permute.xlu1 %184 }
  0xea   :  { %vm187_vm3 = vcmp.eq.s32.totalorder %v177_v52, %v185_v53 }
  0xeb   :  { %v3247_v60 = vsel %vm187_vm3, 1.0, %v4488_v1 }
 0x131   :  { %v231_v25 = vpop.f32.mrf.mxu1 }
 0x132   :  { %v237_v26 = vmax.f32 %v231_v25, 1.0 }
 0x133   :  { %v3748_v27 = vpop.f32.mrf.mxu1 }
 0x134   :  { %4305 = vrcp.f32 %v237_v26 }
 0x135   :  { %v234_v28 = vpop.f32.mrf.mxu1 }
 0x137   :  { %v3749_v29 = vpop.f32.mrf.mxu1 }
 0x138   :  { %v4150_v29 = vld [vmem:[#allocation9 + $0x10] sm:$0xff]  }
 0x141   :  { %v4306_v30 = vpop.eup %4305 }
 0x142   :  { %516 = vperm.xlu0 %4110, %v4306_v30   ;;  %v4151_v30 = vld [vmem:[#allocation9 + $0x8] sm:$0xff]  }
 0x146   :  { %181 = vperm.xlu0 %4110, %v178_v42  }
 0x151   :  { %v351_v32 = vpop.f32.mrf.mxu1 }
 0x152   :  { %v352_v34 = vadd.f32 %v3249_v31, %v351_v32 }
 0x153   :  { %v3768_v33 = vpop.f32.mrf.mxu1 }
 0x154   :  { %v358_v38 = vmax.f32 %v352_v34, 0.0 }
 0x155   :  { %v354_v35 = vpop.f32.mrf.mxu1 }
 0x156   :  { %v355_v36 = vadd.f32 %v3249_v31, %v354_v35  ;;  %v4152_v31 = vld [vmem:[#allocation9] sm:$0xff]   ;;  %v3270_v35 = vld [vmem:[%s4977_s8] ss:$0 sm:$0xff] }
 0x157   :  { %v3769_v37 = vpop.f32.mrf.mxu1 }
 0x158   :  { %v359_v39 = vmax.f32 %v355_v36, 0.0 }
 0x15a   :  { %v360_v40 = vpack.c.bf16 %v359_v39, %v358_v38 }
 0x15c   :  { %3787 = vmatmul.mubr.bf16.vlgmr.msra.gmra.mxu0 %v360_v40 }
 0x15d   :  { %3818 = vmatprep.mubr.msk.bf16.mxu0 %vm4489_vm0, %v4488_v1  ;;  %3803 = vmatpush3.bf16.msra.mxu0 %v4145_v19  ;;  %v4766_v19 = vld [vmem:[%s4971_s2] sm:$0xff]  }
 0x15e   :  { %3804 = vmatprep.subr.bf16.mxu0 %v4488_v1 }
 0x161   :  { %3805 = vmatpush3.bf16.msra.mxu0 %v4146_v20  ;;  %v4165_v20 = vld [vmem:[#allocation7 + $0xe8] sm:$0xff]  }
 0x162   :  { %3806 = vmatprep.subr.bf16.mxu0 %v4488_v1 }
 0x165   :  { %3807 = vmatpush3.bf16.msra.mxu0 %v4147_v21  ;;  %v4166_v21 = vld [vmem:[#allocation7 + $0xa8] sm:$0xff]  }
 0x166   :  { %3808 = vmatprep.subr.bf16.mxu0 %v4488_v1 }
 0x169   :  { %3809 = vmatpush3.bf16.msra.mxu0 %v4148_v22  ;;  %v4167_v22 = vld [vmem:[#allocation7 + $0xe0] sm:$0xff]  }
 0x16a   :  { %3810 = vmatprep.subr.bf16.mxu0 %v4488_v1 }
 0x16d   :  { %3811 = vmatpush3.bf16.msra.mxu0 %v4149_v23  ;;  %v4168_v23 = vld [vmem:[#allocation7 + $0xa0] sm:$0xff]  }
 0x16e   :  { %3812 = vmatprep.subr.bf16.mxu0 %v4488_v1 }
 0x171   :  { %3813 = vmatpush3.bf16.msra.mxu0 %v4150_v29  ;;  %v4174_v29 = vld [vmem:[#allocation7 + $0x88] sm:$0xff]  }
 0x172   :  { %3814 = vmatprep.subr.bf16.mxu0 %v4488_v1 }
 0x175   :  { %3815 = vmatpush3.bf16.msra.mxu0 %v4151_v30  ;;  %v4175_v30 = vld [vmem:[#allocation7 + $0xc0] sm:$0xff]  }
 0x176   :  { %3816 = vmatprep.subr.bf16.mxu0 %v4488_v1 }
 0x179   :  { %3817 = vmatpush3.bf16.msra.mxu0 %v4152_v31  ;;  %v4176_v31 = vld [vmem:[#allocation7 + $0x80] sm:$0xff]  }
 0x17a   :  { %3828 = vmatprep.subr.bf16.mxu0 %v4488_v1 }
 0x1bd   :  { %v4703_v51 = vpop.permute.xlu0 %516 }
 0x1c1   :  { %v182_v54 = vpop.permute.xlu0 %181 }
 0x1c2   :  { %vm186_vm4 = vcmp.eq.s32.totalorder %v177_v52, %v182_v54  ;;  %v4160_v52 = vld [vmem:[#allocation10] sm:$0xff]   ;;  %v3287_v54 = vld [vmem:[%s4979_s10] ss:$0 sm:$0xff] }
 0x1c3   :  { %v3246_v61 = vsel %vm186_vm4, 1.0, %v4488_v1 }
 0x1c4   :  { %v4713_v3 = vpack.c.bf16 %v3247_v60, %v3246_v61 }
 0x21c   :  { %v466_v43 = vpop.f32.mrf.mxu0 }
 0x21d   :  { %v467_v47 = vadd.f32 %v3259_v44, %v466_v43  ;;  %v4153_v43 = vld [vmem:[#allocation10 + $0x38] sm:$0xff]  }
 0x21e   :  { %v3788_v45 = vpop.f32.mrf.mxu0 }
 0x21f   :  { %v4154_v45 = vld [vmem:[#allocation10 + $0x30] sm:$0xff]  }
 0x220   :  { %v469_v46 = vpop.f32.mrf.mxu0 }
 0x221   :  { %v470_v48 = vadd.f32 %v3259_v44, %v469_v46  ;;  %v4155_v46 = vld [vmem:[#allocation10 + $0x28] sm:$0xff]  }
 0x222   :  { %v3789_v49 = vpop.f32.mrf.mxu0 }
 0x223   :  { %v473_v50 = vpack.c.bf16 %v470_v48, %v467_v47  ;;  %v4156_v47 = vld [vmem:[#allocation10 + $0x20] sm:$0xff]   ;;  %v4157_v48 = vld [vmem:[#allocation10 + $0x18] sm:$0xff]   ;;  %v4158_v49 = vld [vmem:[#allocation10 + $0x10] sm:$0xff]  }
 0x225   :  { %3791 = vmatpush3.bf16.msra.mxu1 %v473_v50  ;;  %v4159_v50 = vld [vmem:[#allocation10 + $0x8] sm:$0xff]  }
 0x226   :  { %3796 = vmatprep.subr.bf16.mxu1 %v4488_v1 }
 0x228   :  { %3793 = vmatmul.mubr.msk.bf16.vlgmr.msra.gmra.mxu1 %vm193_vm2, %v4639_v7 }
 0x229   :  { %3798 = vmatprep.mubr.msk.bf16.mxu1 %vm4489_vm0, %v4488_v1 }
 0x2e8   :  { %v508_v55 = vpop.f32.mrf.mxu1 }
 0x2e9   :  { %v519_v56 = vmul.f32 %v4703_v51, %v508_v55 }
 0x2ea   :  { %v3794_v57 = vpop.f32.mrf.mxu1 }
 0x2eb   :  { %v4707_v58 = vpack.c.bf16 %v519_v56, %v519_v56 }
 0x2ec   :  { %v511_v62 = vpop.f32.mrf.mxu1 }
 0x2ed   :  { %v527_v63 = vsel %vm525_vm5, %v4707_v58, 0 }
 0x2ee   :  { %v3795_v0 = vpop.f32.mrf.mxu1  ;;  %3797 = vmatpush3.bf16.msra.mxu1 %v527_v63 }
 0x2ef   :  { %3508 = vmatprep.subr.bf16.mxu1 %v4129_v59 }
 0x2f1   :  { %3799 = vmatmul.mubr.msk.bf16.vlgmr.msra.gmra.mxu1 %vm521_vm6, %v4713_v3 }
 0x2f2   :  { %3509 = vmatpush3.bf16.msra.mxu1 %v4130_v2  ;;  %738 = vmatprep.mubr.bf16.mxu1 %v4676_v15  ;;  %v4142_v15 = vld [vmem:[#allocation7 + $0x8] sm:$0xff]   ;;  %v3297_v2 = vld [vmem:[%s4981_s12] ss:$0 sm:$0xff] }
 0x2f3   :  { %3510 = vmatprep.subr.bf16.mxu1 %v4131_v4 }
 0x2f6   :  { %3511 = vmatpush3.bf16.msra.mxu1 %v4132_v5 }
 0x2f7   :  { %3512 = vmatprep.subr.bf16.mxu1 %v4133_v6 }
 0x2fa   :  { %3513 = vmatpush3.bf16.msra.mxu1 %v4134_v8 }
 0x2fb   :  { %3514 = vmatprep.subr.bf16.mxu1 %v4135_v9 }
 0x2fe   :  { %3515 = vmatpush3.bf16.msra.mxu1 %v4136_v10 }
 0x2ff   :  { %3516 = vmatprep.subr.bf16.mxu1 %v4137_v11 }
 0x302   :  { %3517 = vmatpush3.bf16.msra.mxu1 %v4138_v12 }
 0x303   :  { %3518 = vmatprep.subr.bf16.mxu1 %v4139_v13 }
 0x306   :  { %3519 = vmatpush3.bf16.msra.mxu1 %v4140_v14  ;;  %v4161_v14 = vld [vmem:[#allocation7 + $0xf8] sm:$0xff]  }
 0x307   :  { %3520 = vmatprep.subr.bf16.mxu1 %v4141_v16 }
 0x30a   :  { %3521 = vmatpush3.bf16.msra.mxu1 %v4142_v15  ;;  %v4162_v15 = vld [vmem:[#allocation7 + $0xb8] sm:$0xff]  }
 0x30b   :  { %3522 = vmatprep.subr.bf16.mxu1 %v4143_v17  ;;  %v4163_v17 = vld [vmem:[#allocation7 + $0xf0] sm:$0xff]  }
 0x30e   :  { %3523 = vmatpush3.bf16.msra.mxu1 %v4144_v18  ;;  %v4164_v18 = vld [vmem:[#allocation7 + $0xb0] sm:$0xff]  }
 0x30f   :  { %3822 = vmatprep.subr.bf16.mxu1 %v4488_v1 }
 0x3b1   :  { %v563_v24 = vpop.f32.mrf.mxu1 }
 0x3b3   :  { %v3800_v25 = vpop.f32.mrf.mxu1 }
 0x3b4   :  { %v4170_v25 = vld [vmem:[#allocation7 + $0x98] sm:$0xff]  }
 0x3b5   :  { %v566_v26 = vpop.f32.mrf.mxu1 }
 0x3b6   :  { %v570_v27 = vpack.c.bf16 %v566_v26, %v563_v24  ;;  %v4169_v24 = vld [vmem:[#allocation7 + $0xd8] sm:$0xff]   ;;  %v4171_v26 = vld [vmem:[#allocation7 + $0xd0] sm:$0xff]  }
 0x3b7   :  { %v3801_v28 = vpop.f32.mrf.mxu1 }
 0x3b8   :  { %739 = vmatmul.mubr.bf16.vlgmr.msra.gmra.mxu1 %v570_v27  ;;  %v4172_v27 = vld [vmem:[#allocation7 + $0x90] sm:$0xff]   ;;  %v4173_v28 = vld [vmem:[#allocation7 + $0xc8] sm:$0xff]  }
 0x3b9   :  { %3824 = vmatprep.mubr.msk.bf16.mxu1 %vm4489_vm0, %v4488_v1 }
 0x478   :  { %v3524_v32 = vpop.f32.mrf.mxu1 }
 0x47a   :  { %v3525_v33 = vpop.f32.mrf.mxu1 }
 0x47b   :  { %v3526_v34 = vadd.f32 %v3525_v33, %v3524_v32  ;;  %v4177_v32 = vld [vmem:[#allocation9 + $0x78] sm:$0xff]   ;;  %v4178_v33 = vld [vmem:[#allocation9 + $0x70] sm:$0xff]  }
 0x47c   :  { %v3527_v36 = vpop.f32.mrf.mxu1 }
 0x47d   :  { %v741_v38 = vadd.f32 %v3526_v34, %v3270_v35  ;;  %v4179_v34 = vld [vmem:[#allocation9 + $0x68] sm:$0xff]  }
 0x47e   :  { %v3528_v37 = vpop.f32.mrf.mxu1 }
 0x47f   :  { %v3529_v39 = vadd.f32 %v3528_v37, %v3527_v36  ;;  %v747_v41 = vmax.f32 %v741_v38, 0.0 }
 0x481   :  { %v744_v40 = vadd.f32 %v3529_v39, %v3270_v35  ;;  %v4180_v35 = vld [vmem:[#allocation9 + $0x60] sm:$0xff]  }
 0x483   :  { %v748_v42 = vmax.f32 %v744_v40, 0.0 }
 0x485   :  { %v749_v44 = vpack.c.bf16 %v748_v42, %v747_v41  ;;  %v4181_v41 = vld [vmem:[#allocation9 + $0x58] sm:$0xff]   ;;  %v4182_v42 = vld [vmem:[#allocation9 + $0x50] sm:$0xff]  }
 0x487   :  { %3819 = vmatmul.mubr.bf16.vlgmr.msra.gmra.mxu0 %v749_v44  ;;  %v4184_v44 = vld [vmem:[#allocation9 + $0x40] sm:$0xff]  }
 0x488   :  { %3829 = vmatpush3.bf16.msra.mxu0 %v4153_v43  ;;  %3844 = vmatprep.mubr.msk.bf16.mxu0 %vm4489_vm0, %v4488_v1  ;;  %v4183_v43 = vld [vmem:[#allocation9 + $0x48] sm:$0xff]  }
 0x489   :  { %3830 = vmatprep.subr.bf16.mxu0 %v4488_v1 }
 0x48c   :  { %3831 = vmatpush3.bf16.msra.mxu0 %v4154_v45 }
 0x48d   :  { %3832 = vmatprep.subr.bf16.mxu0 %v4488_v1 }
 0x490   :  { %3833 = vmatpush3.bf16.msra.mxu0 %v4155_v46 }
 0x491   :  { %3834 = vmatprep.subr.bf16.mxu0 %v4488_v1 }
 0x494   :  { %3835 = vmatpush3.bf16.msra.mxu0 %v4156_v47 }
 0x495   :  { %3836 = vmatprep.subr.bf16.mxu0 %v4488_v1 }
 0x498   :  { %3837 = vmatpush3.bf16.msra.mxu0 %v4157_v48  ;;  %v3308_v48 = vld [vmem:[%s4977_s8 + $0x1] ss:$0 sm:$0xff] }
 0x499   :  { %3838 = vmatprep.subr.bf16.mxu0 %v4488_v1 }
 0x49c   :  { %3839 = vmatpush3.bf16.msra.mxu0 %v4158_v49 }
 0x49d   :  { %3840 = vmatprep.subr.bf16.mxu0 %v4488_v1 }
 0x4a0   :  { %3841 = vmatpush3.bf16.msra.mxu0 %v4159_v50 }
 0x4a1   :  { %3842 = vmatprep.subr.bf16.mxu0 %v4488_v1 }
 0x4a4   :  { %3843 = vmatpush3.bf16.msra.mxu0 %v4160_v52 }
 0x4a5   :  { %3854 = vmatprep.subr.bf16.mxu0 %v4488_v1 }
 0x4a7   :  { %3845 = vmatmul.mubr.bf16.vlgmr.msra.gmra.mxu0 %v4707_v58 }
 0x4a8   :  { %3870 = vmatprep.mubr.msk.bf16.mxu0 %vm4489_vm0, %v4488_v1  ;;  %3855 = vmatpush3.bf16.msra.mxu0 %v4177_v32  ;;  %v4196_v32 = vld [vmem:[#allocation7 + $0x130] sm:$0xff]  }
 0x4a9   :  { %3856 = vmatprep.subr.bf16.mxu0 %v4488_v1 }
 0x4ac   :  { %3857 = vmatpush3.bf16.msra.mxu0 %v4178_v33  ;;  %v4197_v33 = vld [vmem:[#allocation7 + $0x168] sm:$0xff]  }
 0x4ad   :  { %3858 = vmatprep.subr.bf16.mxu0 %v4488_v1 }
 0x4b0   :  { %3859 = vmatpush3.bf16.msra.mxu0 %v4179_v34  ;;  %v4198_v34 = vld [vmem:[#allocation7 + $0x128] sm:$0xff]  }
 0x4b1   :  { %3860 = vmatprep.subr.bf16.mxu0 %v4488_v1 }
 0x4b4   :  { %3861 = vmatpush3.bf16.msra.mxu0 %v4180_v35  ;;  %v4199_v35 = vld [vmem:[#allocation7 + $0x160] sm:$0xff]  }
 0x4b5   :  { %3862 = vmatprep.subr.bf16.mxu0 %v4488_v1 }
 0x4b8   :  { %3863 = vmatpush3.bf16.msra.mxu0 %v4181_v41  ;;  %v4205_v41 = vld [vmem:[#allocation7 + $0x148] sm:$0xff]  }
 0x4b9   :  { %3864 = vmatprep.subr.bf16.mxu0 %v4488_v1 }
 0x4bc   :  { %3865 = vmatpush3.bf16.msra.mxu0 %v4182_v42  ;;  %v4206_v42 = vld [vmem:[#allocation7 + $0x108] sm:$0xff]  }
 0x4bd   :  { %3866 = vmatprep.subr.bf16.mxu0 %v4488_v1 }
 0x4c0   :  { %3867 = vmatpush3.bf16.msra.mxu0 %v4183_v43  ;;  %v4207_v43 = vld [vmem:[#allocation7 + $0x140] sm:$0xff]  }
 0x4c1   :  { %3868 = vmatprep.subr.bf16.mxu0 %v4488_v1 }
 0x4c4   :  { %3869 = vmatpush3.bf16.msra.mxu0 %v4184_v44  ;;  %v4208_v44 = vld [vmem:[#allocation7 + $0x100] sm:$0xff]  }
 0x4c5   :  { %3900 = vmatprep.subr.bf16.mxu0 %v4488_v1 }
 0x547   :  { %v855_v53 = vpop.f32.mrf.mxu0 }
 0x548   :  { %v856_v57 = vadd.f32 %v3287_v54, %v855_v53 }
 0x549   :  { %v3820_v55 = vpop.f32.mrf.mxu0 }
 0x54b   :  { %v858_v56 = vpop.f32.mrf.mxu0 }
 0x54c   :  { %v859_v59 = vadd.f32 %v3287_v54, %v858_v56 }
 0x54d   :  { %v3821_v60 = vpop.f32.mrf.mxu0 }
 0x54e   :  { %v862_v61 = vpack.c.bf16 %v859_v59, %v856_v57  ;;  %v3326_v60 = vld [vmem:[%s4979_s10 + $0x1] ss:$0 sm:$0xff] }
 0x550   :  { %3823 = vmatpush3.bf16.msra.mxu1 %v862_v61 }
 0x551   :  { %3848 = vmatprep.subr.bf16.mxu1 %v4488_v1 }
 0x553   :  { %3825 = vmatmul.mubr.msk.bf16.vlgmr.msra.gmra.mxu1 %vm193_vm2, %v4639_v7 }
 0x554   :  { %3850 = vmatprep.mubr.msk.bf16.mxu1 %vm4489_vm0, %v4488_v1 }
 0x567   :  { %v1009_v58 = vpop.f32.mrf.mxu0 }
 0x568   :  { %v1010_v5 = vadd.f32 %v3297_v2, %v1009_v58 }
 0x569   :  { %v3846_v62 = vpop.f32.mrf.mxu0 }
 0x56b   :  { %v1012_v63 = vpop.f32.mrf.mxu0 }
 0x56d   :  { %v3847_v0 = vpop.f32.mrf.mxu0 }
 0x613   :  { %v897_v4 = vpop.f32.mrf.mxu1 }
 0x614   :  { %v903_v6 = vmul.f32 %v897_v4, %v4703_v51  ;;  %v4185_v4 = vld [vmem:[#allocation10 + $0x78] sm:$0xff]  }
 0x615   :  { %v3826_v8 = vpop.f32.mrf.mxu1 }
 0x616   :  { %v1015_v9 = vadd.f32 %v1010_v5, %v903_v6  ;;  %v4186_v5 = vld [vmem:[#allocation10 + $0x70] sm:$0xff]   ;;  %v4187_v6 = vld [vmem:[#allocation10 + $0x68] sm:$0xff]   ;;  %v4188_v8 = vld [vmem:[#allocation10 + $0x60] sm:$0xff]  }
 0x617   :  { %v900_v10 = vpop.f32.mrf.mxu1 }
 0x618   :  { %v1016_v11 = vmax.f32 %v1015_v9, 0.0  ;;  %v4189_v9 = vld [vmem:[#allocation10 + $0x58] sm:$0xff]   ;;  %v4190_v10 = vld [vmem:[#allocation10 + $0x50] sm:$0xff]  }
 0x619   :  { %v3827_v12 = vpop.f32.mrf.mxu1 }
 0x61a   :  { %v4757_v13 = vpack.c.bf16 %v1016_v11, %v1016_v11  ;;  %v4191_v11 = vld [vmem:[#allocation10 + $0x48] sm:$0xff]   ;;  %v4192_v12 = vld [vmem:[#allocation10 + $0x40] sm:$0xff]  }
 0x61c   :  { %v1019_v16 = vsel %vm525_vm5, %v4757_v13, 0 }
 0x61d   :  { %3849 = vmatpush3.bf16.msra.mxu1 %v1019_v16 }
 0x61e   :  { %3552 = vmatprep.subr.bf16.mxu1 %v4161_v14 }
 0x620   :  { %3851 = vmatmul.mubr.msk.bf16.vlgmr.msra.gmra.mxu1 %vm521_vm6, %v4713_v3 }
 0x621   :  { %3553 = vmatpush3.bf16.msra.mxu1 %v4162_v15  ;;  %1232 = vmatprep.mubr.bf16.mxu1 %v4766_v19 }
 0x622   :  { %3554 = vmatprep.subr.bf16.mxu1 %v4163_v17 }
 0x625   :  { %3555 = vmatpush3.bf16.msra.mxu1 %v4164_v18  ;;  %v3337_v18 = vld [vmem:[%s4981_s12 + $0x1] ss:$0 sm:$0xff] }
 0x626   :  { %3556 = vmatprep.subr.bf16.mxu1 %v4165_v20 }
 0x629   :  { %3557 = vmatpush3.bf16.msra.mxu1 %v4166_v21 }
 0x62a   :  { %3558 = vmatprep.subr.bf16.mxu1 %v4167_v22 }
 0x62d   :  { %3559 = vmatpush3.bf16.msra.mxu1 %v4168_v23 }
 0x62e   :  { %3560 = vmatprep.subr.bf16.mxu1 %v4169_v24 }
 0x631   :  { %3561 = vmatpush3.bf16.msra.mxu1 %v4170_v25 }
 0x632   :  { %3562 = vmatprep.subr.bf16.mxu1 %v4171_v26 }
 0x635   :  { %3563 = vmatpush3.bf16.msra.mxu1 %v4172_v27 }
 0x636   :  { %3564 = vmatprep.subr.bf16.mxu1 %v4173_v28  ;;  %v4193_v28 = vld [vmem:[#allocation7 + $0x178] sm:$0xff]  }
 0x639   :  { %3565 = vmatpush3.bf16.msra.mxu1 %v4174_v29 }
 0x63a   :  { %3566 = vmatprep.subr.bf16.mxu1 %v4175_v30  ;;  %v4194_v30 = vld [vmem:[#allocation7 + $0x138] sm:$0xff]  }
 0x63d   :  { %3567 = vmatpush3.bf16.msra.mxu1 %v4176_v31  ;;  %v4195_v31 = vld [vmem:[#allocation7 + $0x170] sm:$0xff]  }
 0x63e   :  { %3874 = vmatprep.subr.bf16.mxu1 %v4488_v1 }
 0x6e0   :  { %v1055_v36 = vpop.f32.mrf.mxu1 }
 0x6e2   :  { %v3852_v37 = vpop.f32.mrf.mxu1 }
 0x6e3   :  { %v4201_v37 = vld [vmem:[#allocation7 + $0x158] sm:$0xff]  }
 0x6e4   :  { %v1058_v38 = vpop.f32.mrf.mxu1 }
 0x6e5   :  { %v1062_v39 = vpack.c.bf16 %v1058_v38, %v1055_v36  ;;  %v4200_v36 = vld [vmem:[#allocation7 + $0x120] sm:$0xff]   ;;  %v4202_v38 = vld [vmem:[#allocation7 + $0x118] sm:$0xff]  }
 0x6e6   :  { %v3853_v40 = vpop.f32.mrf.mxu1 }
 0x6e7   :  { %1233 = vmatmul.mubr.bf16.vlgmr.msra.gmra.mxu1 %v1062_v39  ;;  %v4203_v39 = vld [vmem:[#allocation7 + $0x150] sm:$0xff]  }
 0x6e8   :  { %3876 = vmatprep.mubr.msk.bf16.mxu1 %vm4489_vm0, %v4488_v1  ;;  %v4204_v40 = vld [vmem:[#allocation7 + $0x110] sm:$0xff]  }
 0x7a7   :  { %v3568_v45 = vpop.f32.mrf.mxu1 }
 0x7a9   :  { %v3569_v46 = vpop.f32.mrf.mxu1 }
 0x7aa   :  { %v3570_v47 = vadd.f32 %v3569_v46, %v3568_v45  ;;  %v4209_v45 = vld [vmem:[#allocation9 + $0xb8] sm:$0xff]   ;;  %v4210_v46 = vld [vmem:[#allocation9 + $0xb0] sm:$0xff]  }
 0x7ab   :  { %v3571_v49 = vpop.f32.mrf.mxu1 }
 0x7ac   :  { %v1235_v52 = vadd.f32 %v3570_v47, %v3308_v48  ;;  %v4211_v47 = vld [vmem:[#allocation9 + $0xa8] sm:$0xff]  }
 0x7ad   :  { %v3572_v50 = vpop.f32.mrf.mxu1 }
 0x7ae   :  { %v3573_v53 = vadd.f32 %v3572_v50, %v3571_v49  ;;  %v1241_v55 = vmax.f32 %v1235_v52, 0.0 }
 0x7b0   :  { %v1238_v54 = vadd.f32 %v3573_v53, %v3308_v48  ;;  %v4212_v48 = vld [vmem:[#allocation9 + $0xa0] sm:$0xff]  }
 0x7b2   :  { %v1242_v56 = vmax.f32 %v1238_v54, 0.0 }
 0x7b4   :  { %v1243_v57 = vpack.c.bf16 %v1242_v56, %v1241_v55  ;;  %v4213_v55 = vld [vmem:[#allocation9 + $0x98] sm:$0xff]   ;;  %v4214_v56 = vld [vmem:[#allocation9 + $0x90] sm:$0xff]  }
 0x7b6   :  { %3871 = vmatmul.mubr.bf16.vlgmr.msra.gmra.mxu0 %v1243_v57  ;;  %v4215_v57 = vld [vmem:[#allocation9 + $0x88] sm:$0xff]  }
 0x7b7   :  { %3902 = vmatprep.mubr.msk.bf16.mxu0 %vm4489_vm0, %v4488_v1 }
 0x876   :  { %v1351_v59 = vpop.f32.mrf.mxu0 }
 0x877   :  { %v1352_v62 = vadd.f32 %v3326_v60, %v1351_v59  ;;  %v4216_v59 = vld [vmem:[#allocation9 + $0x80] sm:$0xff]  }
 0x878   :  { %v3872_v61 = vpop.f32.mrf.mxu0 }
 0x87a   :  { %v1354_v58 = vpop.f32.mrf.mxu0 }
 0x87b   :  { %v1355_v63 = vadd.f32 %v3326_v60, %v1354_v58 }
 0x87c   :  { %v3873_v0 = vpop.f32.mrf.mxu0 }
 0x87d   :  { %v1358_v2 = vpack.c.bf16 %v1355_v63, %v1352_v62  ;;  %v3348_v62 = vld [vmem:[%s4977_s8 + $0x2] ss:$0 sm:$0xff] }
 0x87f   :  { %3875 = vmatpush3.bf16.msra.mxu1 %v1358_v2 }
 0x880   :  { %3880 = vmatprep.subr.bf16.mxu1 %v4488_v1 }
 0x882   :  { %3877 = vmatmul.mubr.msk.bf16.vlgmr.msra.gmra.mxu1 %vm193_vm2, %v4639_v7 }
 0x883   :  { %3881 = vmatpush3.bf16.msra.mxu1 %v4185_v4  ;;  %3896 = vmatprep.mubr.msk.bf16.mxu1 %vm4489_vm0, %v4488_v1 }
 0x884   :  { %3882 = vmatprep.subr.bf16.mxu1 %v4488_v1 }
 0x887   :  { %3883 = vmatpush3.bf16.msra.mxu1 %v4186_v5 }
 0x888   :  { %3884 = vmatprep.subr.bf16.mxu1 %v4488_v1 }
 0x88b   :  { %3885 = vmatpush3.bf16.msra.mxu1 %v4187_v6 }
 0x88c   :  { %3886 = vmatprep.subr.bf16.mxu1 %v4488_v1 }
 0x88f   :  { %3887 = vmatpush3.bf16.msra.mxu1 %v4188_v8 }
 0x890   :  { %3888 = vmatprep.subr.bf16.mxu1 %v4488_v1 }
 0x893   :  { %3889 = vmatpush3.bf16.msra.mxu1 %v4189_v9 }
 0x894   :  { %3890 = vmatprep.subr.bf16.mxu1 %v4488_v1 }
 0x897   :  { %3891 = vmatpush3.bf16.msra.mxu1 %v4190_v10 }
 0x898   :  { %3892 = vmatprep.subr.bf16.mxu1 %v4488_v1 }
 0x89b   :  { %3893 = vmatpush3.bf16.msra.mxu1 %v4191_v11  ;;  %v3366_v11 = vld [vmem:[%s4979_s10 + $0x2] ss:$0 sm:$0xff] }
 0x89c   :  { %3894 = vmatprep.subr.bf16.mxu1 %v4488_v1 }
 0x89f   :  { %3895 = vmatpush3.bf16.msra.mxu1 %v4192_v12 }
 0x8a0   :  { %3906 = vmatprep.subr.bf16.mxu1 %v4488_v1 }
 0x8a2   :  { %3897 = vmatmul.mubr.bf16.vlgmr.msra.gmra.mxu1 %v4757_v13 }
 0x8a3   :  { %3922 = vmatprep.mubr.msk.bf16.mxu1 %vm4489_vm0, %v4488_v1  ;;  %3907 = vmatpush3.bf16.msra.mxu1 %v4209_v45  ;;  %v4228_v45 = vld [vmem:[#allocation7 + $0x1b0] sm:$0xff]  }
 0x8a4   :  { %3908 = vmatprep.subr.bf16.mxu1 %v4488_v1 }
 0x8a7   :  { %3909 = vmatpush3.bf16.msra.mxu1 %v4210_v46  ;;  %v4229_v46 = vld [vmem:[#allocation7 + $0x1e8] sm:$0xff]  }
 0x8a8   :  { %3910 = vmatprep.subr.bf16.mxu1 %v4488_v1 }
 0x8ab   :  { %3911 = vmatpush3.bf16.msra.mxu1 %v4211_v47  ;;  %v4230_v47 = vld [vmem:[#allocation7 + $0x1a8] sm:$0xff]  }
 0x8ac   :  { %3912 = vmatprep.subr.bf16.mxu1 %v4488_v1 }
 0x8af   :  { %3913 = vmatpush3.bf16.msra.mxu1 %v4212_v48  ;;  %v4231_v48 = vld [vmem:[#allocation7 + $0x1e0] sm:$0xff]  }
 0x8b0   :  { %3914 = vmatprep.subr.bf16.mxu1 %v4488_v1 }
 0x8b3   :  { %3915 = vmatpush3.bf16.msra.mxu1 %v4213_v55  ;;  %v4237_v55 = vld [vmem:[#allocation7 + $0x1c8] sm:$0xff]  }
 0x8b4   :  { %3916 = vmatprep.subr.bf16.mxu1 %v4488_v1 }
 0x8b7   :  { %3917 = vmatpush3.bf16.msra.mxu1 %v4214_v56  ;;  %v4238_v56 = vld [vmem:[#allocation7 + $0x188] sm:$0xff]  }
 0x8b8   :  { %3918 = vmatprep.subr.bf16.mxu1 %v4488_v1 }
 0x8bb   :  { %3919 = vmatpush3.bf16.msra.mxu1 %v4215_v57  ;;  %v4239_v57 = vld [vmem:[#allocation7 + $0x1c0] sm:$0xff]  }
 0x8bc   :  { %3920 = vmatprep.subr.bf16.mxu1 %v4488_v1 }
 0x8bf   :  { %3921 = vmatpush3.bf16.msra.mxu1 %v4216_v59  ;;  %v4240_v59 = vld [vmem:[#allocation7 + $0x180] sm:$0xff]  }
 0x8c0   :  { %3952 = vmatprep.subr.bf16.mxu1 %v4488_v1 }
 0x942   :  { %v1393_v14 = vpop.f32.mrf.mxu1 }
 0x943   :  { %v1399_v21 = vmul.f32 %v1393_v14, %v4703_v51 }
 0x944   :  { %v3878_v16 = vpop.f32.mrf.mxu1 }
 0x946   :  { %v1396_v15 = vpop.f32.mrf.mxu1 }
 0x948   :  { %v3879_v17 = vpop.f32.mrf.mxu1 }
 0x962   :  { %v1507_v20 = vpop.f32.mrf.mxu1 }
 0x963   :  { %v1508_v22 = vadd.f32 %v3337_v18, %v1507_v20  ;;  %v4217_v20 = vld [vmem:[#allocation10 + $0xb8] sm:$0xff]  }
 0x964   :  { %v3898_v23 = vpop.f32.mrf.mxu1 }
 0x965   :  { %v1513_v24 = vadd.f32 %v1508_v22, %v1399_v21  ;;  %v4218_v21 = vld [vmem:[#allocation10 + $0xb0] sm:$0xff]   ;;  %v4219_v22 = vld [vmem:[#allocation10 + $0xa8] sm:$0xff]   ;;  %v4220_v23 = vld [vmem:[#allocation10 + $0xa0] sm:$0xff]  }
 0x966   :  { %v1510_v25 = vpop.f32.mrf.mxu1 }
 0x967   :  { %v1514_v26 = vmax.f32 %v1513_v24, 0.0  ;;  %v4221_v24 = vld [vmem:[#allocation10 + $0x98] sm:$0xff]   ;;  %v4222_v25 = vld [vmem:[#allocation10 + $0x90] sm:$0xff]  }
 0x968   :  { %v3899_v13 = vpop.f32.mrf.mxu1 }
 0x969   :  { %v4808_v27 = vpack.c.bf16 %v1514_v26, %v1514_v26  ;;  %v4223_v26 = vld [vmem:[#allocation10 + $0x88] sm:$0xff]   ;;  %v4224_v13 = vld [vmem:[#allocation10 + $0x80] sm:$0xff]  }
 0x96b   :  { %v1517_v29 = vsel %vm525_vm5, %v4808_v27, 0 }
 0x96c   :  { %3901 = vmatpush3.bf16.msra.mxu0 %v1517_v29 }
 0x96d   :  { %3596 = vmatprep.subr.bf16.mxu0 %v4193_v28 }
 0x96f   :  { %3903 = vmatmul.mubr.msk.bf16.vlgmr.msra.gmra.mxu0 %vm521_vm6, %v4713_v3 }
 0x970   :  { %3597 = vmatpush3.bf16.msra.mxu0 %v4194_v30  ;;  %1730 = vmatprep.mubr.bf16.mxu0 %v4766_v19 }
 0x971   :  { %3598 = vmatprep.subr.bf16.mxu0 %v4195_v31 }
 0x974   :  { %3599 = vmatpush3.bf16.msra.mxu0 %v4196_v32  ;;  %v3377_v32 = vld [vmem:[%s4981_s12 + $0x2] ss:$0 sm:$0xff] }
 0x975   :  { %3600 = vmatprep.subr.bf16.mxu0 %v4197_v33 }
 0x978   :  { %3601 = vmatpush3.bf16.msra.mxu0 %v4198_v34 }
 0x979   :  { %3602 = vmatprep.subr.bf16.mxu0 %v4199_v35 }
 0x97c   :  { %3603 = vmatpush3.bf16.msra.mxu0 %v4200_v36 }
 0x97d   :  { %3604 = vmatprep.subr.bf16.mxu0 %v4201_v37 }
 0x980   :  { %3605 = vmatpush3.bf16.msra.mxu0 %v4202_v38 }
 0x981   :  { %3606 = vmatprep.subr.bf16.mxu0 %v4203_v39 }
 0x984   :  { %3607 = vmatpush3.bf16.msra.mxu0 %v4204_v40 }
 0x985   :  { %3608 = vmatprep.subr.bf16.mxu0 %v4205_v41  ;;  %v4225_v41 = vld [vmem:[#allocation7 + $0x1f8] sm:$0xff]  }
 0x988   :  { %3609 = vmatpush3.bf16.msra.mxu0 %v4206_v42 }
 0x989   :  { %3610 = vmatprep.subr.bf16.mxu0 %v4207_v43  ;;  %v4226_v43 = vld [vmem:[#allocation7 + $0x1b8] sm:$0xff]  }
 0x98c   :  { %3611 = vmatpush3.bf16.msra.mxu0 %v4208_v44  ;;  %v4227_v44 = vld [vmem:[#allocation7 + $0x1f0] sm:$0xff]  }
 0x98d   :  { %3926 = vmatprep.subr.bf16.mxu0 %v4488_v1 }
 0xa2f   :  { %v1553_v49 = vpop.f32.mrf.mxu0 }
 0xa31   :  { %v3904_v50 = vpop.f32.mrf.mxu0 }
 0xa32   :  { %v4233_v50 = vld [vmem:[#allocation7 + $0x1d8] sm:$0xff]  }
 0xa33   :  { %v1556_v52 = vpop.f32.mrf.mxu0 }
 0xa34   :  { %v1560_v53 = vpack.c.bf16 %v1556_v52, %v1553_v49  ;;  %v4232_v49 = vld [vmem:[#allocation7 + $0x1a0] sm:$0xff]   ;;  %v4234_v52 = vld [vmem:[#allocation7 + $0x198] sm:$0xff]  }
 0xa35   :  { %v3905_v54 = vpop.f32.mrf.mxu0 }
 0xa36   :  { %1731 = vmatmul.mubr.bf16.vlgmr.msra.gmra.mxu0 %v1560_v53  ;;  %v4235_v53 = vld [vmem:[#allocation7 + $0x1d0] sm:$0xff]  }
 0xa37   :  { %3928 = vmatprep.mubr.msk.bf16.mxu0 %vm4489_vm0, %v4488_v1  ;;  %v4236_v54 = vld [vmem:[#allocation7 + $0x190] sm:$0xff]  }
 0xaf6   :  { %v3612_v60 = vpop.f32.mrf.mxu0 }
 0xaf8   :  { %v3613_v61 = vpop.f32.mrf.mxu0 }
 0xaf9   :  { %v3614_v58 = vadd.f32 %v3613_v61, %v3612_v60  ;;  %v4241_v60 = vld [vmem:[#allocation9 + $0xf8] sm:$0xff]   ;;  %v4242_v61 = vld [vmem:[#allocation9 + $0xf0] sm:$0xff]  }
 0xafa   :  { %v3615_v63 = vpop.f32.mrf.mxu0 }
 0xafb   :  { %v1733_v2 = vadd.f32 %v3614_v58, %v3348_v62  ;;  %v4243_v58 = vld [vmem:[#allocation9 + $0xe8] sm:$0xff]  }
 0xafc   :  { %v3616_v0 = vpop.f32.mrf.mxu0 }
 0xafd   :  { %v3617_v4 = vadd.f32 %v3616_v0, %v3615_v63  ;;  %v1739_v6 = vmax.f32 %v1733_v2, 0.0 }
 0xaff   :  { %v1736_v5 = vadd.f32 %v3617_v4, %v3348_v62  ;;  %v4244_v62 = vld [vmem:[#allocation9 + $0xe0] sm:$0xff]  }
 0xb01   :  { %v1740_v8 = vmax.f32 %v1736_v5, 0.0 }
 0xb03   :  { %v1741_v9 = vpack.c.bf16 %v1740_v8, %v1739_v6  ;;  %v4245_v6 = vld [vmem:[#allocation9 + $0xd8] sm:$0xff]   ;;  %v4246_v8 = vld [vmem:[#allocation9 + $0xd0] sm:$0xff]  }
 0xb05   :  { %3923 = vmatmul.mubr.bf16.vlgmr.msra.gmra.mxu1 %v1741_v9  ;;  %v4247_v9 = vld [vmem:[#allocation9 + $0xc8] sm:$0xff]  }
 0xb06   :  { %3954 = vmatprep.mubr.msk.bf16.mxu1 %vm4489_vm0, %v4488_v1 }
 0xbc5   :  { %v1849_v10 = vpop.f32.mrf.mxu1 }
 0xbc6   :  { %v1850_v16 = vadd.f32 %v3366_v11, %v1849_v10  ;;  %v4248_v10 = vld [vmem:[#allocation9 + $0xc0] sm:$0xff]  }
 0xbc7   :  { %v3924_v12 = vpop.f32.mrf.mxu1 }
 0xbc9   :  { %v1852_v14 = vpop.f32.mrf.mxu1 }
 0xbca   :  { %v1853_v15 = vadd.f32 %v3366_v11, %v1852_v14 }
 0xbcb   :  { %v3925_v17 = vpop.f32.mrf.mxu1 }
 0xbcc   :  { %v1856_v18 = vpack.c.bf16 %v1853_v15, %v1850_v16  ;;  %v3388_v16 = vld [vmem:[%s4977_s8 + $0x3] ss:$0 sm:$0xff] }
 0xbce   :  { %3927 = vmatpush3.bf16.msra.mxu0 %v1856_v18 }
 0xbcf   :  { %3932 = vmatprep.subr.bf16.mxu0 %v4488_v1 }
 0xbd1   :  { %3929 = vmatmul.mubr.msk.bf16.vlgmr.msra.gmra.mxu0 %vm193_vm2, %v4639_v7 }
 0xbd2   :  { %3933 = vmatpush3.bf16.msra.mxu0 %v4217_v20  ;;  %3948 = vmatprep.mubr.msk.bf16.mxu0 %vm4489_vm0, %v4488_v1 }
 0xbd3   :  { %3934 = vmatprep.subr.bf16.mxu0 %v4488_v1 }
 0xbd6   :  { %3935 = vmatpush3.bf16.msra.mxu0 %v4218_v21 }
 0xbd7   :  { %3936 = vmatprep.subr.bf16.mxu0 %v4488_v1 }
 0xbda   :  { %3937 = vmatpush3.bf16.msra.mxu0 %v4219_v22 }
 0xbdb   :  { %3938 = vmatprep.subr.bf16.mxu0 %v4488_v1 }
 0xbde   :  { %3939 = vmatpush3.bf16.msra.mxu0 %v4220_v23 }
 0xbdf   :  { %3940 = vmatprep.subr.bf16.mxu0 %v4488_v1 }
 0xbe2   :  { %3941 = vmatpush3.bf16.msra.mxu0 %v4221_v24 }
 0xbe3   :  { %3942 = vmatprep.subr.bf16.mxu0 %v4488_v1 }
 0xbe6   :  { %3943 = vmatpush3.bf16.msra.mxu0 %v4222_v25 }
 0xbe7   :  { %3944 = vmatprep.subr.bf16.mxu0 %v4488_v1 }
 0xbea   :  { %3945 = vmatpush3.bf16.msra.mxu0 %v4223_v26  ;;  %v3406_v26 = vld [vmem:[%s4979_s10 + $0x3] ss:$0 sm:$0xff] }
 0xbeb   :  { %3946 = vmatprep.subr.bf16.mxu0 %v4488_v1 }
 0xbee   :  { %3947 = vmatpush3.bf16.msra.mxu0 %v4224_v13 }
 0xbef   :  { %3958 = vmatprep.subr.bf16.mxu0 %v4488_v1 }
 0xbf1   :  { %3949 = vmatmul.mubr.bf16.vlgmr.msra.gmra.mxu0 %v4808_v27 }
 0xbf2   :  { %3974 = vmatprep.mubr.msk.bf16.mxu0 %vm4489_vm0, %v4488_v1  ;;  %3959 = vmatpush3.bf16.msra.mxu0 %v4241_v60  ;;  %v4260_v60 = vld [vmem:[#allocation7 + $0x230] sm:$0xff]  }
 0xbf3   :  { %3960 = vmatprep.subr.bf16.mxu0 %v4488_v1 }
 0xbf6   :  { %3961 = vmatpush3.bf16.msra.mxu0 %v4242_v61  ;;  %v4261_v61 = vld [vmem:[#allocation7 + $0x268] sm:$0xff]  }
 0xbf7   :  { %3962 = vmatprep.subr.bf16.mxu0 %v4488_v1 }
 0xbfa   :  { %3963 = vmatpush3.bf16.msra.mxu0 %v4243_v58  ;;  %v4262_v58 = vld [vmem:[#allocation7 + $0x228] sm:$0xff]  }
 0xbfb   :  { %3964 = vmatprep.subr.bf16.mxu0 %v4488_v1 }
 0xbfe   :  { %3965 = vmatpush3.bf16.msra.mxu0 %v4244_v62  ;;  %v4263_v62 = vld [vmem:[#allocation7 + $0x260] sm:$0xff]  }
 0xbff   :  { %3966 = vmatprep.subr.bf16.mxu0 %v4488_v1 }
 0xc02   :  { %3967 = vmatpush3.bf16.msra.mxu0 %v4245_v6  ;;  %v4271_v6 = vld [vmem:[#allocation7 + $0x240] sm:$0xff]  }
 0xc03   :  { %3968 = vmatprep.subr.bf16.mxu0 %v4488_v1 }
 0xc06   :  { %3969 = vmatpush3.bf16.msra.mxu0 %v4246_v8  ;;  %v4272_v8 = vld [vmem:[#allocation7 + $0x200] sm:$0xff]  }
 0xc07   :  { %3970 = vmatprep.subr.bf16.mxu0 %v4488_v1 }
 0xc0a   :  { %3971 = vmatpush3.bf16.msra.mxu0 %v4247_v9  ;;  %v4273_v9 = vld [vmem:[#allocation9 + $0x138] sm:$0xff]  }
 0xc0b   :  { %3972 = vmatprep.subr.bf16.mxu0 %v4488_v1 }
 0xc0e   :  { %3973 = vmatpush3.bf16.msra.mxu0 %v4248_v10  ;;  %v4274_v10 = vld [vmem:[#allocation9 + $0x130] sm:$0xff]  }
 0xc0f   :  { %4004 = vmatprep.subr.bf16.mxu0 %v4488_v1 }
 0xc91   :  { %v1891_v28 = vpop.f32.mrf.mxu0 }
 0xc92   :  { %v1897_v34 = vmul.f32 %v1891_v28, %v4703_v51 }
 0xc93   :  { %v3930_v29 = vpop.f32.mrf.mxu0 }
 0xc95   :  { %v1894_v30 = vpop.f32.mrf.mxu0 }
 0xc97   :  { %v3931_v31 = vpop.f32.mrf.mxu0 }
 0xcb1   :  { %v2005_v33 = vpop.f32.mrf.mxu0 }
 0xcb2   :  { %v2006_v35 = vadd.f32 %v3377_v32, %v2005_v33  ;;  %v4249_v33 = vld [vmem:[#allocation10 + $0xf8] sm:$0xff]  }
 0xcb3   :  { %v3950_v36 = vpop.f32.mrf.mxu0 }
 0xcb4   :  { %v2011_v37 = vadd.f32 %v2006_v35, %v1897_v34  ;;  %v4250_v34 = vld [vmem:[#allocation10 + $0xf0] sm:$0xff]   ;;  %v4251_v35 = vld [vmem:[#allocation10 + $0xe8] sm:$0xff]   ;;  %v4252_v36 = vld [vmem:[#allocation10 + $0xe0] sm:$0xff]  }
 0xcb5   :  { %v2008_v38 = vpop.f32.mrf.mxu0 }
 0xcb6   :  { %v2012_v39 = vmax.f32 %v2011_v37, 0.0  ;;  %v4253_v37 = vld [vmem:[#allocation10 + $0xd8] sm:$0xff]   ;;  %v4254_v38 = vld [vmem:[#allocation10 + $0xd0] sm:$0xff]  }
 0xcb7   :  { %v3951_v27 = vpop.f32.mrf.mxu0 }
 0xcb8   :  { %v4854_v40 = vpack.c.bf16 %v2012_v39, %v2012_v39  ;;  %v4255_v39 = vld [vmem:[#allocation10 + $0xc8] sm:$0xff]   ;;  %v4256_v27 = vld [vmem:[#allocation10 + $0xc0] sm:$0xff]  }
 0xcba   :  { %v2015_v42 = vsel %vm525_vm5, %v4854_v40, 0 }
 0xcbb   :  { %3953 = vmatpush3.bf16.msra.mxu1 %v2015_v42 }
 0xcbc   :  { %3640 = vmatprep.subr.bf16.mxu1 %v4225_v41 }
 0xcbe   :  { %3955 = vmatmul.mubr.msk.bf16.vlgmr.msra.gmra.mxu1 %vm521_vm6, %v4713_v3 }
 0xcbf   :  { %3641 = vmatpush3.bf16.msra.mxu1 %v4226_v43  ;;  %2228 = vmatprep.mubr.bf16.mxu1 %v4766_v19 }
 0xcc0   :  { %3642 = vmatprep.subr.bf16.mxu1 %v4227_v44 }
 0xcc3   :  { %3643 = vmatpush3.bf16.msra.mxu1 %v4228_v45  ;;  %v3417_v45 = vld [vmem:[%s4981_s12 + $0x3] ss:$0 sm:$0xff] }
 0xcc4   :  { %3644 = vmatprep.subr.bf16.mxu1 %v4229_v46 }
 0xcc7   :  { %3645 = vmatpush3.bf16.msra.mxu1 %v4230_v47 }
 0xcc8   :  { %3646 = vmatprep.subr.bf16.mxu1 %v4231_v48 }
 0xccb   :  { %3647 = vmatpush3.bf16.msra.mxu1 %v4232_v49 }
 0xccc   :  { %3648 = vmatprep.subr.bf16.mxu1 %v4233_v50 }
 0xccf   :  { %3649 = vmatpush3.bf16.msra.mxu1 %v4234_v52 }
 0xcd0   :  { %3650 = vmatprep.subr.bf16.mxu1 %v4235_v53 }
 0xcd3   :  { %3651 = vmatpush3.bf16.msra.mxu1 %v4236_v54 }
 0xcd4   :  { %3652 = vmatprep.subr.bf16.mxu1 %v4237_v55  ;;  %v4257_v55 = vld [vmem:[#allocation7 + $0x278] sm:$0xff]  }
 0xcd7   :  { %3653 = vmatpush3.bf16.msra.mxu1 %v4238_v56 }
 0xcd8   :  { %3654 = vmatprep.subr.bf16.mxu1 %v4239_v57  ;;  %v4258_v57 = vld [vmem:[#allocation7 + $0x238] sm:$0xff]  }
 0xcdb   :  { %3655 = vmatpush3.bf16.msra.mxu1 %v4240_v59  ;;  %v4259_v59 = vld [vmem:[#allocation7 + $0x270] sm:$0xff]  }
 0xcdc   :  { %3978 = vmatprep.subr.bf16.mxu1 %v4488_v1 }
 0xd7e   :  { %v2051_v63 = vpop.f32.mrf.mxu1 }
 0xd80   :  { %v3956_v0 = vpop.f32.mrf.mxu1 }
 0xd81   :  { %v4265_v0 = vld [vmem:[#allocation7 + $0x258] sm:$0xff]  }
 0xd82   :  { %v2054_v2 = vpop.f32.mrf.mxu1 }
 0xd83   :  { %v2058_v4 = vpack.c.bf16 %v2054_v2, %v2051_v63  ;;  %v4264_v63 = vld [vmem:[#allocation7 + $0x220] sm:$0xff]   ;;  %v4266_v2 = vld [vmem:[#allocation7 + $0x218] sm:$0xff]  }
 0xd84   :  { %v3957_v5 = vpop.f32.mrf.mxu1 }
 0xd85   :  { %2229 = vmatmul.mubr.bf16.vlgmr.msra.gmra.mxu1 %v2058_v4  ;;  %v4267_v4 = vld [vmem:[#allocation7 + $0x250] sm:$0xff]   ;;  %v4269_v5 = vld [vmem:[#allocation7 + $0x248] sm:$0xff]  }
 0xd86   :  { %3980 = vmatprep.mubr.msk.bf16.mxu1 %vm4489_vm0, %v4488_v1 }
 0xe45   :  { %v3656_v11 = vpop.f32.mrf.mxu1 }
 0xe47   :  { %v3657_v12 = vpop.f32.mrf.mxu1 }
 0xe48   :  { %v3658_v14 = vadd.f32 %v3657_v12, %v3656_v11  ;;  %v4275_v11 = vld [vmem:[#allocation9 + $0x128] sm:$0xff]   ;;  %v4276_v12 = vld [vmem:[#allocation9 + $0x120] sm:$0xff]  }
 0xe49   :  { %v3659_v15 = vpop.f32.mrf.mxu1 }
 0xe4a   :  { %v2231_v18 = vadd.f32 %v3658_v14, %v3388_v16 }
 0xe4b   :  { %v3660_v17 = vpop.f32.mrf.mxu1 }
 0xe4c   :  { %v3661_v20 = vadd.f32 %v3660_v17, %v3659_v15  ;;  %v2237_v22 = vmax.f32 %v2231_v18, 0.0 }
 0xe4e   :  { %v2234_v21 = vadd.f32 %v3661_v20, %v3388_v16  ;;  %v4277_v20 = vld [vmem:[#allocation9 + $0x118] sm:$0xff]  }
 0xe50   :  { %v2238_v23 = vmax.f32 %v2234_v21, 0.0  ;;  %v4278_v21 = vld [vmem:[#allocation9 + $0x110] sm:$0xff]  }
 0xe52   :  { %v2239_v24 = vpack.c.bf16 %v2238_v23, %v2237_v22  ;;  %v4279_v22 = vld [vmem:[#allocation9 + $0x108] sm:$0xff]   ;;  %v4280_v23 = vld [vmem:[#allocation9 + $0x100] sm:$0xff]  }
 0xe54   :  { %3975 = vmatmul.mubr.bf16.vlgmr.msra.gmra.mxu0 %v2239_v24 }
 0xe55   :  { %4006 = vmatprep.mubr.msk.bf16.mxu0 %vm4489_vm0, %v4488_v1 }
 0xf14   :  { %v2347_v25 = vpop.f32.mrf.mxu0 }
 0xf15   :  { %v2348_v29 = vadd.f32 %v3406_v26, %v2347_v25 }
 0xf16   :  { %v3976_v13 = vpop.f32.mrf.mxu0 }
 0xf17   :  { %v3428_v13 = vld [vmem:[%s4977_s8 + $0x4] ss:$0 sm:$0xff] }
 0xf18   :  { %v2350_v28 = vpop.f32.mrf.mxu0 }
 0xf19   :  { %v2351_v30 = vadd.f32 %v3406_v26, %v2350_v28 }
 0xf1a   :  { %v3977_v31 = vpop.f32.mrf.mxu0 }
 0xf1b   :  { %v2354_v32 = vpack.c.bf16 %v2351_v30, %v2348_v29 }
 0xf1d   :  { %3979 = vmatpush3.bf16.msra.mxu1 %v2354_v32 }
 0xf1e   :  { %3984 = vmatprep.subr.bf16.mxu1 %v4488_v1 }
 0xf20   :  { %3981 = vmatmul.mubr.msk.bf16.vlgmr.msra.gmra.mxu1 %vm193_vm2, %v4639_v7 }
 0xf21   :  { %3985 = vmatpush3.bf16.msra.mxu1 %v4249_v33  ;;  %4000 = vmatprep.mubr.msk.bf16.mxu1 %vm4489_vm0, %v4488_v1 }
 0xf22   :  { %3986 = vmatprep.subr.bf16.mxu1 %v4488_v1 }
 0xf25   :  { %3987 = vmatpush3.bf16.msra.mxu1 %v4250_v34 }
 0xf26   :  { %3988 = vmatprep.subr.bf16.mxu1 %v4488_v1 }
 0xf29   :  { %3989 = vmatpush3.bf16.msra.mxu1 %v4251_v35 }
 0xf2a   :  { %3990 = vmatprep.subr.bf16.mxu1 %v4488_v1 }
 0xf2d   :  { %3991 = vmatpush3.bf16.msra.mxu1 %v4252_v36 }
 0xf2e   :  { %3992 = vmatprep.subr.bf16.mxu1 %v4488_v1 }
 0xf31   :  { %3993 = vmatpush3.bf16.msra.mxu1 %v4253_v37  ;;  %v3446_v37 = vld [vmem:[%s4979_s10 + $0x4] ss:$0 sm:$0xff] }
 0xf32   :  { %3994 = vmatprep.subr.bf16.mxu1 %v4488_v1 }
 0xf35   :  { %3995 = vmatpush3.bf16.msra.mxu1 %v4254_v38 }
 0xf36   :  { %3996 = vmatprep.subr.bf16.mxu1 %v4488_v1 }
 0xf39   :  { %3997 = vmatpush3.bf16.msra.mxu1 %v4255_v39 }
 0xf3a   :  { %3998 = vmatprep.subr.bf16.mxu1 %v4488_v1 }
 0xf3d   :  { %3999 = vmatpush3.bf16.msra.mxu1 %v4256_v27 }
 0xf3e   :  { %4010 = vmatprep.subr.bf16.mxu1 %v4488_v1 }
 0xf40   :  { %4001 = vmatmul.mubr.bf16.vlgmr.msra.gmra.mxu1 %v4854_v40 }
 0xf41   :  { %4026 = vmatprep.mubr.msk.bf16.mxu1 %vm4489_vm0, %v4488_v1  ;;  %4011 = vmatpush3.bf16.msra.mxu1 %v4273_v9 }
 0xf42   :  { %4012 = vmatprep.subr.bf16.mxu1 %v4488_v1 }
 0xf45   :  { %4013 = vmatpush3.bf16.msra.mxu1 %v4274_v10 }
 0xf46   :  { %4014 = vmatprep.subr.bf16.mxu1 %v4488_v1 }
 0xf49   :  { %4015 = vmatpush3.bf16.msra.mxu1 %v4275_v11 }
 0xf4a   :  { %4016 = vmatprep.subr.bf16.mxu1 %v4488_v1 }
 0xf4d   :  { %4017 = vmatpush3.bf16.msra.mxu1 %v4276_v12 }
 0xf4e   :  { %4018 = vmatprep.subr.bf16.mxu1 %v4488_v1 }
 0xf51   :  { %4019 = vmatpush3.bf16.msra.mxu1 %v4277_v20 }
 0xf52   :  { %4020 = vmatprep.subr.bf16.mxu1 %v4488_v1 }
 0xf55   :  { %4021 = vmatpush3.bf16.msra.mxu1 %v4278_v21 }
 0xf56   :  { %4022 = vmatprep.subr.bf16.mxu1 %v4488_v1 }
 0xf59   :  { %4023 = vmatpush3.bf16.msra.mxu1 %v4279_v22 }
 0xf5a   :  { %4024 = vmatprep.subr.bf16.mxu1 %v4488_v1 }
 0xf5d   :  { %4025 = vmatpush3.bf16.msra.mxu1 %v4280_v23 }
 0xf5e   :  { %4056 = vmatprep.subr.bf16.mxu1 %v4488_v1 }
 0xfe0   :  { %v2389_v41 = vpop.f32.mrf.mxu1 }
 0xfe1   :  { %v2395_v47 = vmul.f32 %v2389_v41, %v4703_v51 }
 0xfe2   :  { %v3982_v42 = vpop.f32.mrf.mxu1 }
 0xfe4   :  { %v2392_v43 = vpop.f32.mrf.mxu1 }
 0xfe6   :  { %v3983_v44 = vpop.f32.mrf.mxu1 }
 0xfe7   :  { %v4281_v44 = vld [vmem:[#allocation10 + $0x138] sm:$0xff]  }
0x1000   :  { %v2503_v46 = vpop.f32.mrf.mxu1 }
0x1001   :  { %v2504_v48 = vadd.f32 %v3417_v45, %v2503_v46  ;;  %v4282_v45 = vld [vmem:[#allocation10 + $0x130] sm:$0xff]   ;;  %v4283_v46 = vld [vmem:[#allocation10 + $0x128] sm:$0xff]  }
0x1002   :  { %v4002_v49 = vpop.f32.mrf.mxu1 }
0x1003   :  { %v2509_v50 = vadd.f32 %v2504_v48, %v2395_v47  ;;  %v4284_v47 = vld [vmem:[#allocation10 + $0x120] sm:$0xff]   ;;  %v4285_v48 = vld [vmem:[#allocation10 + $0x118] sm:$0xff]   ;;  %v4287_v49 = vld [vmem:[#allocation10 + $0x108] sm:$0xff]  }
0x1004   :  { %v2506_v52 = vpop.f32.mrf.mxu1 }
0x1005   :  { %v2510_v53 = vmax.f32 %v2509_v50, 0.0  ;;  %v4288_v50 = vld [vmem:[#allocation10 + $0x100] sm:$0xff]   ;;  %v4289_v52 = vld [vmem:[#allocation12 + $0x38] sm:$0xff]  }
0x1006   :  { %v4003_v40 = vpop.f32.mrf.mxu1 }
0x1007   :  { %v4900_v54 = vpack.c.bf16 %v2510_v53, %v2510_v53  ;;  %v4290_v53 = vld [vmem:[#allocation12 + $0x30] sm:$0xff]   ;;  %v4291_v40 = vld [vmem:[#allocation12 + $0x28] sm:$0xff]  }
0x1009   :  { %v2513_v56 = vsel %vm525_vm5, %v4900_v54, 0 }
0x100a   :  { %4005 = vmatpush3.bf16.msra.mxu0 %v2513_v56  ;;  %v4293_v56 = vld [vmem:[#allocation12 + $0x18] sm:$0xff]  }
0x100b   :  { %3684 = vmatprep.subr.bf16.mxu0 %v4257_v55  ;;  %v4292_v55 = vld [vmem:[#allocation12 + $0x20] sm:$0xff]  }
0x100d   :  { %4007 = vmatmul.mubr.msk.bf16.vlgmr.msra.gmra.mxu0 %vm521_vm6, %v4713_v3  ;;  %v4268_v3 = vld [vmem:[#allocation7 + $0x210] sm:$0xff]  }
0x100e   :  { %3685 = vmatpush3.bf16.msra.mxu0 %v4258_v57  ;;  %2726 = vmatprep.mubr.bf16.mxu0 %v4766_v19  ;;  %v4270_v19 = vld [vmem:[#allocation7 + $0x208] sm:$0xff]  }
0x100f   :  { %3686 = vmatprep.subr.bf16.mxu0 %v4259_v59  ;;  %v4295_v57 = vld [vmem:[#allocation12 + $0x8] sm:$0xff]   ;;  %v4296_v59 = vld [vmem:[#allocation12] sm:$0xff]  }
0x1012   :  { %3687 = vmatpush3.bf16.msra.mxu0 %v4260_v60  ;;  %v4297_v60 = vld [vmem:[#allocation13 + $0x38] sm:$0xff]  }
0x1013   :  { %3688 = vmatprep.subr.bf16.mxu0 %v4261_v61  ;;  %v4298_v61 = vld [vmem:[#allocation13 + $0x30] sm:$0xff]  }
0x1016   :  { %3689 = vmatpush3.bf16.msra.mxu0 %v4262_v58  ;;  %v4299_v58 = vld [vmem:[#allocation13 + $0x28] sm:$0xff]  }
0x1017   :  { %3690 = vmatprep.subr.bf16.mxu0 %v4263_v62  ;;  %v4300_v62 = vld [vmem:[#allocation13 + $0x20] sm:$0xff]  }
0x101a   :  { %3691 = vmatpush3.bf16.msra.mxu0 %v4264_v63  ;;  %v4301_v63 = vld [vmem:[#allocation13 + $0x18] sm:$0xff]  }
0x101b   :  { %3692 = vmatprep.subr.bf16.mxu0 %v4265_v0  ;;  %v4302_v0 = vld [vmem:[#allocation13 + $0x10] sm:$0xff]  }
0x101e   :  { %3693 = vmatpush3.bf16.msra.mxu0 %v4266_v2 }
0x101f   :  { %3694 = vmatprep.subr.bf16.mxu0 %v4267_v4 }
0x1022   :  { %3695 = vmatpush3.bf16.msra.mxu0 %v4268_v3 }
0x1023   :  { %3696 = vmatprep.subr.bf16.mxu0 %v4269_v5 }
0x1026   :  { %3697 = vmatpush3.bf16.msra.mxu0 %v4270_v19  ;;  %v3457_v19 = vld [vmem:[%s4981_s12 + $0x4] ss:$0 sm:$0xff] }
0x1027   :  { %3698 = vmatprep.subr.bf16.mxu0 %v4271_v6 }
0x102a   :  { %3699 = vmatpush3.bf16.msra.mxu0 %v4272_v8 }
0x102b   :  { %4030 = vmatprep.subr.bf16.mxu0 %v4488_v1 }
0x10cd   :  { %v2549_v14 = vpop.f32.mrf.mxu0 }
0x10cf   :  { %v4008_v16 = vpop.f32.mrf.mxu0 }
0x10d1   :  { %v2552_v15 = vpop.f32.mrf.mxu0 }
0x10d2   :  { %v2556_v17 = vpack.c.bf16 %v2552_v15, %v2549_v14  ;;  %v4303_v15 = vld [vmem:[#allocation13 + $0x8] sm:$0xff]  }
0x10d3   :  { %v4009_v18 = vpop.f32.mrf.mxu0 }
0x10d4   :  { %2727 = vmatmul.mubr.bf16.vlgmr.msra.gmra.mxu0 %v2556_v17  ;;  %v4304_v17 = vld [vmem:[#allocation13] sm:$0xff]   ;;  %v3466_v18 = vld [vmem:[%s4983_s14] ss:$0 sm:$0xff] }
0x10d5   :  { %4032 = vmatprep.mubr.msk.bf16.mxu0 %vm4489_vm0, %v4488_v1 }
0x1194   :  { %v3700_v24 = vpop.f32.mrf.mxu0 }
0x1196   :  { %v3701_v25 = vpop.f32.mrf.mxu0 }
0x1197   :  { %v3702_v26 = vadd.f32 %v3701_v25, %v3700_v24 }
0x1198   :  { %v3703_v28 = vpop.f32.mrf.mxu0 }
0x1199   :  { %v2729_v30 = vadd.f32 %v3702_v26, %v3428_v13  ;;  %v3475_v26 = vld [vmem:[%s4985_s16] ss:$0 sm:$0xff] }
0x119a   :  { %v3704_v29 = vpop.f32.mrf.mxu0 }
0x119b   :  { %v3705_v31 = vadd.f32 %v3704_v29, %v3703_v28  ;;  %v2735_v33 = vmax.f32 %v2729_v30, 0.0 }
0x119d   :  { %v2732_v32 = vadd.f32 %v3705_v31, %v3428_v13 }
0x119f   :  { %v2736_v34 = vmax.f32 %v2732_v32, 0.0 }
0x11a1   :  { %v2737_v35 = vpack.c.bf16 %v2736_v34, %v2735_v33 }
0x11a3   :  { %4027 = vmatmul.mubr.bf16.vlgmr.msra.gmra.mxu1 %v2737_v35 }
0x11a4   :  { %4072 = vmatprep.mubr.msk.bf16.mxu1 %vm4489_vm0, %v4488_v1  ;;  %4057 = vmatpush3.bf16.msra.mxu1 %v4289_v52 }
0x11a5   :  { %4058 = vmatprep.subr.bf16.mxu1 %v4488_v1 }
0x11a8   :  { %4059 = vmatpush3.bf16.msra.mxu1 %v4290_v53 }
0x11a9   :  { %4060 = vmatprep.subr.bf16.mxu1 %v4488_v1 }
0x11ac   :  { %4061 = vmatpush3.bf16.msra.mxu1 %v4291_v40 }
0x11ad   :  { %4062 = vmatprep.subr.bf16.mxu1 %v4488_v1 }
0x11b0   :  { %4063 = vmatpush3.bf16.msra.mxu1 %v4292_v55 }
0x11b1   :  { %4064 = vmatprep.subr.bf16.mxu1 %v4488_v1 }
0x11b4   :  { %4065 = vmatpush3.bf16.msra.mxu1 %v4293_v56 }
0x11b5   :  { %4066 = vmatprep.subr.bf16.mxu1 %v4488_v1 }
0x1263   :  { %v2845_v36 = vpop.f32.mrf.mxu1 }
0x1264   :  { %v2846_v27 = vadd.f32 %v3446_v37, %v2845_v36 }
0x1265   :  { %v4028_v38 = vpop.f32.mrf.mxu1 }
0x1267   :  { %v2848_v39 = vpop.f32.mrf.mxu1 }
0x1268   :  { %v2849_v41 = vadd.f32 %v3446_v37, %v2848_v39 }
0x1269   :  { %v4029_v42 = vpop.f32.mrf.mxu1 }
0x126a   :  { %v2852_v43 = vpack.c.bf16 %v2849_v41, %v2846_v27 }
0x126c   :  { %4031 = vmatpush3.bf16.msra.mxu0 %v2852_v43 }
0x126d   :  { %4036 = vmatprep.subr.bf16.mxu0 %v4488_v1 }
0x126f   :  { %4033 = vmatmul.mubr.msk.bf16.vlgmr.msra.gmra.mxu0 %vm193_vm2, %v4639_v7  ;;  %v4286_v7 = vld [vmem:[#allocation10 + $0x110] sm:$0xff]  }
0x1270   :  { %4037 = vmatpush3.bf16.msra.mxu0 %v4281_v44  ;;  %4052 = vmatprep.mubr.msk.bf16.mxu0 %vm4489_vm0, %v4488_v1 }
0x1271   :  { %4038 = vmatprep.subr.bf16.mxu0 %v4488_v1 }
0x1274   :  { %4039 = vmatpush3.bf16.msra.mxu0 %v4282_v45 }
0x1275   :  { %4040 = vmatprep.subr.bf16.mxu0 %v4488_v1 }
0x1278   :  { %4041 = vmatpush3.bf16.msra.mxu0 %v4283_v46 }
0x1279   :  { %4042 = vmatprep.subr.bf16.mxu0 %v4488_v1 }
0x127c   :  { %4043 = vmatpush3.bf16.msra.mxu0 %v4284_v47 }
0x127d   :  { %4044 = vmatprep.subr.bf16.mxu0 %v4488_v1 }
0x1280   :  { %4045 = vmatpush3.bf16.msra.mxu0 %v4285_v48 }
0x1281   :  { %4046 = vmatprep.subr.bf16.mxu0 %v4488_v1 }
0x1284   :  { %4047 = vmatpush3.bf16.msra.mxu0 %v4286_v7 }
0x1285   :  { %4048 = vmatprep.subr.bf16.mxu0 %v4488_v1 }
0x1288   :  { %4049 = vmatpush3.bf16.msra.mxu0 %v4287_v49 }
0x1289   :  { %4050 = vmatprep.subr.bf16.mxu0 %v4488_v1 }
0x128c   :  { %4051 = vmatpush3.bf16.msra.mxu0 %v4288_v50 }
0x128d   :  { %4076 = vmatprep.subr.bf16.mxu0 %v4488_v1 }
0x128f   :  { %4053 = vmatmul.mubr.bf16.vlgmr.msra.gmra.mxu0 %v4900_v54  ;;  %v4294_v54 = vld [vmem:[#allocation12 + $0x10] sm:$0xff]  }
0x1290   :  { %4092 = vmatprep.mubr.msk.bf16.mxu0 %vm4489_vm0, %v4488_v1  ;;  %4067 = vmatpush3.bf16.msra.mxu1 %v4294_v54 }
0x1291   :  { %4068 = vmatprep.subr.bf16.mxu1 %v4488_v1  ;;  %4077 = vmatpush3.bf16.msra.mxu0 %v4297_v60 }
0x1292   :  { %4078 = vmatprep.subr.bf16.mxu0 %v4488_v1 }
0x1294   :  { %4069 = vmatpush3.bf16.msra.mxu1 %v4295_v57 }
0x1295   :  { %4070 = vmatprep.subr.bf16.mxu1 %v4488_v1  ;;  %4079 = vmatpush3.bf16.msra.mxu0 %v4298_v61 }
0x1296   :  { %4080 = vmatprep.subr.bf16.mxu0 %v4488_v1 }
0x1298   :  { %4071 = vmatpush3.bf16.msra.mxu1 %v4296_v59 }
0x1299   :  { %4081 = vmatpush3.bf16.msra.mxu0 %v4299_v58 }
0x129a   :  { %4082 = vmatprep.subr.bf16.mxu0 %v4488_v1 }
0x129d   :  { %4083 = vmatpush3.bf16.msra.mxu0 %v4300_v62 }
0x129e   :  { %4084 = vmatprep.subr.bf16.mxu0 %v4488_v1 }
0x12a1   :  { %4085 = vmatpush3.bf16.msra.mxu0 %v4301_v63 }
0x12a2   :  { %4086 = vmatprep.subr.bf16.mxu0 %v4488_v1 }
0x12a5   :  { %4087 = vmatpush3.bf16.msra.mxu0 %v4302_v0 }
0x12a6   :  { %4088 = vmatprep.subr.bf16.mxu0 %v4488_v1 }
0x12a9   :  { %4089 = vmatpush3.bf16.msra.mxu0 %v4303_v15 }
0x12aa   :  { %4090 = vmatprep.subr.bf16.mxu0 %v4488_v1 }
0x12ad   :  { %4091 = vmatpush3.bf16.msra.mxu0 %v4304_v17 }
0x132f   :  { %v2887_v2 = vpop.f32.mrf.mxu0 }
0x1330   :  { %v2893_v8 = vmul.f32 %v2887_v2, %v4703_v51 }
0x1331   :  { %v4034_v4 = vpop.f32.mrf.mxu0 }
0x1333   :  { %v2890_v3 = vpop.f32.mrf.mxu0 }
0x1335   :  { %v4035_v5 = vpop.f32.mrf.mxu0 }
0x134f   :  { %v3001_v6 = vpop.f32.mrf.mxu0 }
0x1350   :  { %v3002_v9 = vadd.f32 %v3457_v19, %v3001_v6 }
0x1351   :  { %v4054_v10 = vpop.f32.mrf.mxu0 }
0x1352   :  { %v3007_v11 = vadd.f32 %v3002_v9, %v2893_v8 }
0x1353   :  { %v3004_v12 = vpop.f32.mrf.mxu0 }
0x1354   :  { %v3008_v14 = vpack.c.bf16 %v3007_v11, %v3007_v11 }
0x1355   :  { %v4055_v16 = vpop.f32.mrf.mxu0 }
0x1356   :  { %4073 = vmatmul.mubr.bf16.vlgmr.msra.gmra.mxu1 %v3008_v14 }
0x1416   :  { %v3114_v20 = vpop.f32.mrf.mxu1 }
0x1417   :  { %v3115_v21 = vadd.f32 %v3466_v18, %v3114_v20 }
0x1418   :  { %v4074_v51 = vpop.f32.mrf.mxu1 }
0x1419   :  { %v3120_v22 = vmax.f32 %v3115_v21, 0.0 }
0x141a   :  { %v3117_v23 = vpop.f32.mrf.mxu1 }
0x141b   :  { %v3121_v24 = vpack.c.bf16 %v3120_v22, %v3120_v22 }
0x141c   :  { %v4075_v25 = vpop.f32.mrf.mxu1 }
0x141d   :  { %4093 = vmatmul.mubr.bf16.vlgmr.msra.gmra.mxu0 %v3121_v24 }
0x14dd   :  { %v3227_v13 = vpop.f32.mrf.mxu0 }
0x14de   :  { %v3228_v1 = vadd.f32 %v3475_v26, %v3227_v13 }
0x14df   :  { %v4094_v28 = vpop.f32.mrf.mxu0 }
0x14e0   :  { %3234 = vst.msk [vmem:[%s4986_s17] sm:$0xff] %vm3233_vm7, %v3228_v1 }
0x14e1   :  { %v3230_v29 = vpop.f32.mrf.mxu0 }
0x14e3   :  { %v4095_v30 = vpop.f32.mrf.mxu0 }
0x14e4   :  { %3239 = vsyncpa [#allocation3], 1 }
0x14e5   :  { %3240 = vsyncpa [#allocation5], 1 }
0x14e6   :  { %3241 = vsyncpa [#allocation8], 1 }
0x14e7   :  { %3242 = vsyncpa [#allocation11], 1 }
0x14e8   :  { %3243 = vsyncpa [#allocation14], 1 }

</bundles_post_ra>
